<compile_context>
chip_gen: v6e
topology: v6e:2x2x1
jax: 0.10.0
libtpu: 0.0.40
codegen_flags: <defaults>
</compile_context>

<pallas_src>
import math

import jax
import jax.numpy as jnp
from jax.experimental import pallas as pl
from jax.experimental.pallas import tpu as pltpu


def _sdpa_kernel(q_ref, k_ref, v_ref, e_ref, attn_ref, sc_ref):
    # Block = one batch element: q/k/v -> (1,H,n,D), e -> (1,H,n,n,D),
    # attn out -> (1,n,H*D), scores out -> (1,n,n*H*D).
    q = q_ref[0]          # (H, n, D)
    k = k_ref[0]          # (H, n, D)
    v = v_ref[0]          # (H, n, D)
    e = e_ref[0]          # (H, n, n, D)
    H, n, D = q.shape

    # Raw (unscaled) scores, head-major:
    #   scores[h, i, j, d] = q[h, i, d] * k[h, j, d] * e[h, i, j, d]
    scores = q[:, :, None, :] * k[:, None, :, :] * e            # (H, n, n, D)

    # logits over the feature dim, scaled by 1/sqrt(D) (scores stay unscaled)
    logits = jnp.sum(scores, axis=-1) * (1.0 / math.sqrt(D))    # (H, n, n)

    # numerically-stable softmax over the key axis j (last axis)
    m = jnp.max(logits, axis=-1, keepdims=True)
    p = jnp.exp(logits - m)
    denom = jnp.sum(p, axis=-1, keepdims=True)
    attn_w = p * pl.reciprocal(denom, approx=True)              # (H, n, n)

    # attn_out[i, h*D + d] = sum_j attn_w[h, i, j] * v[h, j, d]
    attn_cols = []
    for h in range(H):                                          # static unroll
        attn_cols.append(
            jnp.dot(attn_w[h], v[h], preferred_element_type=jnp.float32))
    attn_ref[0] = jnp.concatenate(attn_cols, axis=-1).astype(attn_ref.dtype)

    # scores_out[j, i*(H*D) + h*D + d] = scores[h, i, j, d]
    # Assembled from static leading-dim slices (n_j, D) concatenated along the
    # lane axis -> lane-dense store in the final (j-major) layout.
    sc_cols = []
    for i in range(n):                                          # static unroll
        for h in range(H):
            sc_cols.append(scores[h, i])                        # (n_j, D)
    sc_ref[0] = jnp.concatenate(sc_cols, axis=-1).astype(sc_ref.dtype)


def scaled_dot_product_attention(q, k, v, edges_feats, mask=None, temp=1.0,
                                 dropout=0.0):
    """Pallas implementation of SacledDotProductAttention.forward (mask=None)."""
    assert mask is None, "mask path not implemented"  # TODO(synk): add mask support
    # temp / dropout intentionally unused (matches the reference forward pass).
    B, H, n, D = q.shape
    assert edges_feats.shape == (B, H, n, n, D)

    qkv_spec = pl.BlockSpec((1, H, n, D), lambda b: (b, 0, 0, 0))
    e_spec = pl.BlockSpec((1, H, n, n, D), lambda b: (b, 0, 0, 0, 0))

    attn_out, scores_flat = pl.pallas_call(
        _sdpa_kernel,
        out_shape=(
            jax.ShapeDtypeStruct((B, n, H * D), jnp.float32),
            jax.ShapeDtypeStruct((B, n, n * H * D), jnp.float32),
        ),
        grid_spec=pltpu.PrefetchScalarGridSpec(
            num_scalar_prefetch=0,
            grid=(B,),
            in_specs=[qkv_spec, qkv_spec, qkv_spec, e_spec],
            out_specs=(
                pl.BlockSpec((1, n, H * D), lambda b: (b, 0, 0)),
                pl.BlockSpec((1, n, n * H * D), lambda b: (b, 0, 0)),
            ),
        ),
        compiler_params=pltpu.CompilerParams(
            dimension_semantics=("parallel",),
            vmem_limit_bytes=32 * 1024 * 1024,
        ),
    )(q, k, v, edges_feats)

    # attn_out is already (B, n, H*D) in the final layout.
    # scores: (B, n_j, n_i*H*D) -> (B, n_j, n_i, H*D) is a free contiguous split.
    scores_out = scores_flat.reshape(B, n, n, H * D)
    return attn_out, scores_out


def _reference(q, k, v, edges_feats):
    B, H, n, D = q.shape
    qr = q.reshape(B, H, n, 1, D)
    kr = k.reshape(B, H, 1, n, D)
    scores = qr * kr * edges_feats
    logits = scores.sum(axis=-1) / jnp.sqrt(jnp.float32(D))
    attn = jax.nn.softmax(logits, axis=3)
    out = jnp.einsum("bhij,bhjd->bhid", attn, v)
    out = jnp.transpose(out, (0, 2, 1, 3)).reshape(B, n, H * D)
    sc = jnp.transpose(scores, (0, 3, 2, 1, 4)).reshape(B, n, n, H * D)
    return out, sc


if __name__ == "__main__":
    B, H, n, D = 2, 4, 8, 32      # H*D = 128 -> lane-dense output last dim
    key = jax.random.PRNGKey(0)
    kq, kk, kv, ke = jax.random.split(key, 4)
    q = jax.random.normal(kq, (B, H, n, D), dtype=jnp.float32)
    k = jax.random.normal(kk, (B, H, n, D), dtype=jnp.float32)
    v = jax.random.normal(kv, (B, H, n, D), dtype=jnp.float32)
    edges_feats = jax.random.normal(ke, (B, H, n, n, D), dtype=jnp.float32)

    attn_out, scores_out = scaled_dot_product_attention(q, k, v, edges_feats)
    jax.block_until_ready((attn_out, scores_out))

    ref_attn, ref_scores = _reference(q, k, v, edges_feats)
    assert attn_out.shape == (B, n, H * D)
    assert scores_out.shape == (B, n, n, H * D)
    # scores are exact elementwise products -> tight tolerance
    assert jnp.allclose(scores_out, ref_scores, atol=1e-5, rtol=1e-5)
    # attn uses the EUP approximate reciprocal for the softmax denom -> looser
    assert jnp.allclose(attn_out, ref_attn, atol=2e-3, rtol=2e-3)

    print("KERNEL_OK")
</pallas_src>

<mosaic_0001>
module attributes {stable_mosaic.version = 11 : i64} {
  func.func @_sdpa_kernel(%arg0: i32, %arg1: memref<1x4x8x32xf32, #tpu.memory_space<vmem>>, %arg2: memref<1x4x8x32xf32, #tpu.memory_space<vmem>>, %arg3: memref<1x4x8x32xf32, #tpu.memory_space<vmem>>, %arg4: memref<1x4x8x8x32xf32, #tpu.memory_space<vmem>>, %arg5: memref<1x8x128xf32, #tpu.memory_space<vmem>>, %arg6: memref<1x8x1024xf32, #tpu.memory_space<vmem>>) attributes {dimension_semantics = [#tpu.dimension_semantics<parallel>], iteration_bounds = array<i64: 2>, scalar_prefetch = 0 : i64, scratch_operands = 0 : i64, tpu.core_type = #tpu.core_type<tc>, window_params = [{transform_indices = @transform_0, window_bounds = array<i64: 1, 4, 8, 32>}, {transform_indices = @transform_1, window_bounds = array<i64: 1, 4, 8, 32>}, {transform_indices = @transform_2, window_bounds = array<i64: 1, 4, 8, 32>}, {transform_indices = @transform_3, window_bounds = array<i64: 1, 4, 8, 8, 32>}, {transform_indices = @transform_4, window_bounds = array<i64: 1, 8, 128>}, {transform_indices = @transform_5, window_bounds = array<i64: 1, 8, 1024>}]} {
    %c0 = arith.constant 0 : index
    %c0_0 = arith.constant 0 : index
    %c0_1 = arith.constant 0 : index
    %c0_2 = arith.constant 0 : index
    %0 = vector.load %arg1[%c0, %c0_0, %c0_1, %c0_2] : memref<1x4x8x32xf32, #tpu.memory_space<vmem>>, vector<1x4x8x32xf32>
    %1 = vector.shape_cast %0 : vector<1x4x8x32xf32> to vector<4x8x32xf32>
    %c0_3 = arith.constant 0 : index
    %c0_4 = arith.constant 0 : index
    %c0_5 = arith.constant 0 : index
    %c0_6 = arith.constant 0 : index
    %2 = vector.load %arg2[%c0_3, %c0_4, %c0_5, %c0_6] : memref<1x4x8x32xf32, #tpu.memory_space<vmem>>, vector<1x4x8x32xf32>
    %3 = vector.shape_cast %2 : vector<1x4x8x32xf32> to vector<4x8x32xf32>
    %c0_7 = arith.constant 0 : index
    %c0_8 = arith.constant 0 : index
    %c0_9 = arith.constant 0 : index
    %c0_10 = arith.constant 0 : index
    %4 = vector.load %arg3[%c0_7, %c0_8, %c0_9, %c0_10] : memref<1x4x8x32xf32, #tpu.memory_space<vmem>>, vector<1x4x8x32xf32>
    %5 = vector.shape_cast %4 : vector<1x4x8x32xf32> to vector<4x8x32xf32>
    %c0_11 = arith.constant 0 : index
    %c0_12 = arith.constant 0 : index
    %c0_13 = arith.constant 0 : index
    %c0_14 = arith.constant 0 : index
    %c0_15 = arith.constant 0 : index
    %6 = vector.load %arg4[%c0_11, %c0_12, %c0_13, %c0_14, %c0_15] : memref<1x4x8x8x32xf32, #tpu.memory_space<vmem>>, vector<1x4x8x8x32xf32>
    %7 = vector.shape_cast %6 : vector<1x4x8x8x32xf32> to vector<4x8x8x32xf32>
    %8 = vector.shape_cast %1 : vector<4x8x32xf32> to vector<4x8x1x32xf32>
    %9 = vector.shape_cast %3 : vector<4x8x32xf32> to vector<4x1x8x32xf32>
    %10 = vector.broadcast %8 : vector<4x8x1x32xf32> to vector<4x8x8x32xf32>
    %11 = vector.broadcast %9 : vector<4x1x8x32xf32> to vector<4x8x8x32xf32>
    %12 = arith.mulf %10, %11 : vector<4x8x8x32xf32>
    %13 = arith.mulf %12, %7 : vector<4x8x8x32xf32>
    %cst = arith.constant dense<0.000000e+00> : vector<4x8x8xf32>
    %14 = vector.multi_reduction <add>, %13, %cst [3] : vector<4x8x8x32xf32> to vector<4x8x8xf32>
    %cst_16 = arith.constant 0.176776692 : f32
    %15 = vector.broadcast %cst_16 : f32 to vector<4x8x8xf32>
    %16 = arith.mulf %14, %15 : vector<4x8x8xf32>
    %cst_17 = arith.constant dense<0xFF800000> : vector<4x8xf32>
    %17 = vector.multi_reduction <maximumf>, %16, %cst_17 [2] : vector<4x8x8xf32> to vector<4x8xf32>
    %18 = vector.shape_cast %17 : vector<4x8xf32> to vector<4x8x1xf32>
    %19 = vector.broadcast %18 : vector<4x8x1xf32> to vector<4x8x8xf32>
    %20 = arith.subf %16, %19 : vector<4x8x8xf32>
    %21 = math.exp %20 : vector<4x8x8xf32>
    %cst_18 = arith.constant dense<0.000000e+00> : vector<4x8xf32>
    %22 = vector.multi_reduction <add>, %21, %cst_18 [2] : vector<4x8x8xf32> to vector<4x8xf32>
    %23 = vector.shape_cast %22 : vector<4x8xf32> to vector<4x8x1xf32>
    %24 = tpu.reciprocal %23 {approx = true} : vector<4x8x1xf32> -> vector<4x8x1xf32>
    %25 = vector.broadcast %24 : vector<4x8x1xf32> to vector<4x8x8xf32>
    %26 = arith.mulf %21, %25 : vector<4x8x8xf32>
    %27 = vector.extract_strided_slice %26 {offsets = [0, 0, 0], sizes = [1, 8, 8], strides = [1, 1, 1]} : vector<4x8x8xf32> to vector<1x8x8xf32>
    %28 = vector.shape_cast %27 : vector<1x8x8xf32> to vector<8x8xf32>
    %29 = vector.extract_strided_slice %5 {offsets = [0, 0, 0], sizes = [1, 8, 32], strides = [1, 1, 1]} : vector<4x8x32xf32> to vector<1x8x32xf32>
    %30 = vector.shape_cast %29 : vector<1x8x32xf32> to vector<8x32xf32>
    %cst_19 = arith.constant dense<0.000000e+00> : vector<8x32xf32>
    %31 = tpu.matmul %28, %30, %cst_19 {dimension_numbers = #tpu.dot_dimension_numbers<[1], [0], [0], [1], [0, 0, 1, 1], [], []>} : vector<8x8xf32>, vector<8x32xf32>, vector<8x32xf32> -> vector<8x32xf32>
    %32 = vector.extract_strided_slice %26 {offsets = [1, 0, 0], sizes = [1, 8, 8], strides = [1, 1, 1]} : vector<4x8x8xf32> to vector<1x8x8xf32>
    %33 = vector.shape_cast %32 : vector<1x8x8xf32> to vector<8x8xf32>
    %34 = vector.extract_strided_slice %5 {offsets = [1, 0, 0], sizes = [1, 8, 32], strides = [1, 1, 1]} : vector<4x8x32xf32> to vector<1x8x32xf32>
    %35 = vector.shape_cast %34 : vector<1x8x32xf32> to vector<8x32xf32>
    %cst_20 = arith.constant dense<0.000000e+00> : vector<8x32xf32>
    %36 = tpu.matmul %33, %35, %cst_20 {dimension_numbers = #tpu.dot_dimension_numbers<[1], [0], [0], [1], [0, 0, 1, 1], [], []>} : vector<8x8xf32>, vector<8x32xf32>, vector<8x32xf32> -> vector<8x32xf32>
    %37 = vector.extract_strided_slice %26 {offsets = [2, 0, 0], sizes = [1, 8, 8], strides = [1, 1, 1]} : vector<4x8x8xf32> to vector<1x8x8xf32>
    %38 = vector.shape_cast %37 : vector<1x8x8xf32> to vector<8x8xf32>
    %39 = vector.extract_strided_slice %5 {offsets = [2, 0, 0], sizes = [1, 8, 32], strides = [1, 1, 1]} : vector<4x8x32xf32> to vector<1x8x32xf32>
    %40 = vector.shape_cast %39 : vector<1x8x32xf32> to vector<8x32xf32>
    %cst_21 = arith.constant dense<0.000000e+00> : vector<8x32xf32>
    %41 = tpu.matmul %38, %40, %cst_21 {dimension_numbers = #tpu.dot_dimension_numbers<[1], [0], [0], [1], [0, 0, 1, 1], [], []>} : vector<8x8xf32>, vector<8x32xf32>, vector<8x32xf32> -> vector<8x32xf32>
    %42 = vector.extract_strided_slice %26 {offsets = [3, 0, 0], sizes = [1, 8, 8], strides = [1, 1, 1]} : vector<4x8x8xf32> to vector<1x8x8xf32>
    %43 = vector.shape_cast %42 : vector<1x8x8xf32> to vector<8x8xf32>
    %44 = vector.extract_strided_slice %5 {offsets = [3, 0, 0], sizes = [1, 8, 32], strides = [1, 1, 1]} : vector<4x8x32xf32> to vector<1x8x32xf32>
    %45 = vector.shape_cast %44 : vector<1x8x32xf32> to vector<8x32xf32>
    %cst_22 = arith.constant dense<0.000000e+00> : vector<8x32xf32>
    %46 = tpu.matmul %43, %45, %cst_22 {dimension_numbers = #tpu.dot_dimension_numbers<[1], [0], [0], [1], [0, 0, 1, 1], [], []>} : vector<8x8xf32>, vector<8x32xf32>, vector<8x32xf32> -> vector<8x32xf32>
    %47 = tpu.concatenate %31, %36, %41, %46 in 1 : vector<8x32xf32>, vector<8x32xf32>, vector<8x32xf32>, vector<8x32xf32> -> vector<8x128xf32>
    %c0_23 = arith.constant 0 : index
    %c0_24 = arith.constant 0 : index
    %c0_25 = arith.constant 0 : index
    %48 = vector.load %arg5[%c0_23, %c0_24, %c0_25] : memref<1x8x128xf32, #tpu.memory_space<vmem>>, vector<1x8x128xf32>
    %49 = vector.shape_cast %48 : vector<1x8x128xf32> to vector<8x128xf32>
    %50 = vector.shape_cast %47 : vector<8x128xf32> to vector<1x8x128xf32>
    tpu.vector_store %arg5[%c0_23, %c0_24, %c0_25], %50 {strides = array<i32>} : memref<1x8x128xf32, #tpu.memory_space<vmem>>, vector<1x8x128xf32>,
    %51 = vector.extract_strided_slice %13 {offsets = [0, 0, 0, 0], sizes = [1, 1, 8, 32], strides = [1, 1, 1, 1]} : vector<4x8x8x32xf32> to vector<1x1x8x32xf32>
    %52 = vector.shape_cast %51 : vector<1x1x8x32xf32> to vector<8x32xf32>
    %53 = vector.extract_strided_slice %13 {offsets = [1, 0, 0, 0], sizes = [1, 1, 8, 32], strides = [1, 1, 1, 1]} : vector<4x8x8x32xf32> to vector<1x1x8x32xf32>
    %54 = vector.shape_cast %53 : vector<1x1x8x32xf32> to vector<8x32xf32>
    %55 = vector.extract_strided_slice %13 {offsets = [2, 0, 0, 0], sizes = [1, 1, 8, 32], strides = [1, 1, 1, 1]} : vector<4x8x8x32xf32> to vector<1x1x8x32xf32>
    %56 = vector.shape_cast %55 : vector<1x1x8x32xf32> to vector<8x32xf32>
    %57 = vector.extract_strided_slice %13 {offsets = [3, 0, 0, 0], sizes = [1, 1, 8, 32], strides = [1, 1, 1, 1]} : vector<4x8x8x32xf32> to vector<1x1x8x32xf32>
    %58 = vector.shape_cast %57 : vector<1x1x8x32xf32> to vector<8x32xf32>
    %59 = vector.extract_strided_slice %13 {offsets = [0, 1, 0, 0], sizes = [1, 1, 8, 32], strides = [1, 1, 1, 1]} : vector<4x8x8x32xf32> to vector<1x1x8x32xf32>
    %60 = vector.shape_cast %59 : vector<1x1x8x32xf32> to vector<8x32xf32>
    %61 = vector.extract_strided_slice %13 {offsets = [1, 1, 0, 0], sizes = [1, 1, 8, 32], strides = [1, 1, 1, 1]} : vector<4x8x8x32xf32> to vector<1x1x8x32xf32>
    %62 = vector.shape_cast %61 : vector<1x1x8x32xf32> to vector<8x32xf32>
    %63 = vector.extract_strided_slice %13 {offsets = [2, 1, 0, 0], sizes = [1, 1, 8, 32], strides = [1, 1, 1, 1]} : vector<4x8x8x32xf32> to vector<1x1x8x32xf32>
    %64 = vector.shape_cast %63 : vector<1x1x8x32xf32> to vector<8x32xf32>
    %65 = vector.extract_strided_slice %13 {offsets = [3, 1, 0, 0], sizes = [1, 1, 8, 32], strides = [1, 1, 1, 1]} : vector<4x8x8x32xf32> to vector<1x1x8x32xf32>
    %66 = vector.shape_cast %65 : vector<1x1x8x32xf32> to vector<8x32xf32>
    %67 = vector.extract_strided_slice %13 {offsets = [0, 2, 0, 0], sizes = [1, 1, 8, 32], strides = [1, 1, 1, 1]} : vector<4x8x8x32xf32> to vector<1x1x8x32xf32>
    %68 = vector.shape_cast %67 : vector<1x1x8x32xf32> to vector<8x32xf32>
    %69 = vector.extract_strided_slice %13 {offsets = [1, 2, 0, 0], sizes = [1, 1, 8, 32], strides = [1, 1, 1, 1]} : vector<4x8x8x32xf32> to vector<1x1x8x32xf32>
    %70 = vector.shape_cast %69 : vector<1x1x8x32xf32> to vector<8x32xf32>
    %71 = vector.extract_strided_slice %13 {offsets = [2, 2, 0, 0], sizes = [1, 1, 8, 32], strides = [1, 1, 1, 1]} : vector<4x8x8x32xf32> to vector<1x1x8x32xf32>
    %72 = vector.shape_cast %71 : vector<1x1x8x32xf32> to vector<8x32xf32>
    %73 = vector.extract_strided_slice %13 {offsets = [3, 2, 0, 0], sizes = [1, 1, 8, 32], strides = [1, 1, 1, 1]} : vector<4x8x8x32xf32> to vector<1x1x8x32xf32>
    %74 = vector.shape_cast %73 : vector<1x1x8x32xf32> to vector<8x32xf32>
    %75 = vector.extract_strided_slice %13 {offsets = [0, 3, 0, 0], sizes = [1, 1, 8, 32], strides = [1, 1, 1, 1]} : vector<4x8x8x32xf32> to vector<1x1x8x32xf32>
    %76 = vector.shape_cast %75 : vector<1x1x8x32xf32> to vector<8x32xf32>
    %77 = vector.extract_strided_slice %13 {offsets = [1, 3, 0, 0], sizes = [1, 1, 8, 32], strides = [1, 1, 1, 1]} : vector<4x8x8x32xf32> to vector<1x1x8x32xf32>
    %78 = vector.shape_cast %77 : vector<1x1x8x32xf32> to vector<8x32xf32>
    %79 = vector.extract_strided_slice %13 {offsets = [2, 3, 0, 0], sizes = [1, 1, 8, 32], strides = [1, 1, 1, 1]} : vector<4x8x8x32xf32> to vector<1x1x8x32xf32>
    %80 = vector.shape_cast %79 : vector<1x1x8x32xf32> to vector<8x32xf32>
    %81 = vector.extract_strided_slice %13 {offsets = [3, 3, 0, 0], sizes = [1, 1, 8, 32], strides = [1, 1, 1, 1]} : vector<4x8x8x32xf32> to vector<1x1x8x32xf32>
    %82 = vector.shape_cast %81 : vector<1x1x8x32xf32> to vector<8x32xf32>
    %83 = vector.extract_strided_slice %13 {offsets = [0, 4, 0, 0], sizes = [1, 1, 8, 32], strides = [1, 1, 1, 1]} : vector<4x8x8x32xf32> to vector<1x1x8x32xf32>
    %84 = vector.shape_cast %83 : vector<1x1x8x32xf32> to vector<8x32xf32>
    %85 = vector.extract_strided_slice %13 {offsets = [1, 4, 0, 0], sizes = [1, 1, 8, 32], strides = [1, 1, 1, 1]} : vector<4x8x8x32xf32> to vector<1x1x8x32xf32>
    %86 = vector.shape_cast %85 : vector<1x1x8x32xf32> to vector<8x32xf32>
    %87 = vector.extract_strided_slice %13 {offsets = [2, 4, 0, 0], sizes = [1, 1, 8, 32], strides = [1, 1, 1, 1]} : vector<4x8x8x32xf32> to vector<1x1x8x32xf32>
    %88 = vector.shape_cast %87 : vector<1x1x8x32xf32> to vector<8x32xf32>
    %89 = vector.extract_strided_slice %13 {offsets = [3, 4, 0, 0], sizes = [1, 1, 8, 32], strides = [1, 1, 1, 1]} : vector<4x8x8x32xf32> to vector<1x1x8x32xf32>
    %90 = vector.shape_cast %89 : vector<1x1x8x32xf32> to vector<8x32xf32>
    %91 = vector.extract_strided_slice %13 {offsets = [0, 5, 0, 0], sizes = [1, 1, 8, 32], strides = [1, 1, 1, 1]} : vector<4x8x8x32xf32> to vector<1x1x8x32xf32>
    %92 = vector.shape_cast %91 : vector<1x1x8x32xf32> to vector<8x32xf32>
    %93 = vector.extract_strided_slice %13 {offsets = [1, 5, 0, 0], sizes = [1, 1, 8, 32], strides = [1, 1, 1, 1]} : vector<4x8x8x32xf32> to vector<1x1x8x32xf32>
    %94 = vector.shape_cast %93 : vector<1x1x8x32xf32> to vector<8x32xf32>
    %95 = vector.extract_strided_slice %13 {offsets = [2, 5, 0, 0], sizes = [1, 1, 8, 32], strides = [1, 1, 1, 1]} : vector<4x8x8x32xf32> to vector<1x1x8x32xf32>
    %96 = vector.shape_cast %95 : vector<1x1x8x32xf32> to vector<8x32xf32>
    %97 = vector.extract_strided_slice %13 {offsets = [3, 5, 0, 0], sizes = [1, 1, 8, 32], strides = [1, 1, 1, 1]} : vector<4x8x8x32xf32> to vector<1x1x8x32xf32>
    %98 = vector.shape_cast %97 : vector<1x1x8x32xf32> to vector<8x32xf32>
    %99 = vector.extract_strided_slice %13 {offsets = [0, 6, 0, 0], sizes = [1, 1, 8, 32], strides = [1, 1, 1, 1]} : vector<4x8x8x32xf32> to vector<1x1x8x32xf32>
    %100 = vector.shape_cast %99 : vector<1x1x8x32xf32> to vector<8x32xf32>
    %101 = vector.extract_strided_slice %13 {offsets = [1, 6, 0, 0], sizes = [1, 1, 8, 32], strides = [1, 1, 1, 1]} : vector<4x8x8x32xf32> to vector<1x1x8x32xf32>
    %102 = vector.shape_cast %101 : vector<1x1x8x32xf32> to vector<8x32xf32>
    %103 = vector.extract_strided_slice %13 {offsets = [2, 6, 0, 0], sizes = [1, 1, 8, 32], strides = [1, 1, 1, 1]} : vector<4x8x8x32xf32> to vector<1x1x8x32xf32>
    %104 = vector.shape_cast %103 : vector<1x1x8x32xf32> to vector<8x32xf32>
    %105 = vector.extract_strided_slice %13 {offsets = [3, 6, 0, 0], sizes = [1, 1, 8, 32], strides = [1, 1, 1, 1]} : vector<4x8x8x32xf32> to vector<1x1x8x32xf32>
    %106 = vector.shape_cast %105 : vector<1x1x8x32xf32> to vector<8x32xf32>
    %107 = vector.extract_strided_slice %13 {offsets = [0, 7, 0, 0], sizes = [1, 1, 8, 32], strides = [1, 1, 1, 1]} : vector<4x8x8x32xf32> to vector<1x1x8x32xf32>
    %108 = vector.shape_cast %107 : vector<1x1x8x32xf32> to vector<8x32xf32>
    %109 = vector.extract_strided_slice %13 {offsets = [1, 7, 0, 0], sizes = [1, 1, 8, 32], strides = [1, 1, 1, 1]} : vector<4x8x8x32xf32> to vector<1x1x8x32xf32>
    %110 = vector.shape_cast %109 : vector<1x1x8x32xf32> to vector<8x32xf32>
    %111 = vector.extract_strided_slice %13 {offsets = [2, 7, 0, 0], sizes = [1, 1, 8, 32], strides = [1, 1, 1, 1]} : vector<4x8x8x32xf32> to vector<1x1x8x32xf32>
    %112 = vector.shape_cast %111 : vector<1x1x8x32xf32> to vector<8x32xf32>
    %113 = vector.extract_strided_slice %13 {offsets = [3, 7, 0, 0], sizes = [1, 1, 8, 32], strides = [1, 1, 1, 1]} : vector<4x8x8x32xf32> to vector<1x1x8x32xf32>
    %114 = vector.shape_cast %113 : vector<1x1x8x32xf32> to vector<8x32xf32>
    %115 = tpu.concatenate %52, %54, %56, %58, %60, %62, %64, %66, %68, %70, %72, %74, %76, %78, %80, %82 in 1 : vector<8x32xf32>, vector<8x32xf32>, vector<8x32xf32>, vector<8x32xf32>, vector<8x32xf32>, vector<8x32xf32>, vector<8x32xf32>, vector<8x32xf32>, vector<8x32xf32>, vector<8x32xf32>, vector<8x32xf32>, vector<8x32xf32>, vector<8x32xf32>, vector<8x32xf32>, vector<8x32xf32>, vector<8x32xf32> -> vector<8x512xf32>
    %116 = tpu.concatenate %84, %86, %88, %90, %92, %94, %96, %98, %100, %102, %104, %106, %108, %110, %112, %114 in 1 : vector<8x32xf32>, vector<8x32xf32>, vector<8x32xf32>, vector<8x32xf32>, vector<8x32xf32>, vector<8x32xf32>, vector<8x32xf32>, vector<8x32xf32>, vector<8x32xf32>, vector<8x32xf32>, vector<8x32xf32>, vector<8x32xf32>, vector<8x32xf32>, vector<8x32xf32>, vector<8x32xf32>, vector<8x32xf32> -> vector<8x512xf32>
    %117 = tpu.concatenate %115, %116 in 1 : vector<8x512xf32>, vector<8x512xf32> -> vector<8x1024xf32>
    %c0_26 = arith.constant 0 : index
    %c0_27 = arith.constant 0 : index
    %c0_28 = arith.constant 0 : index
    %118 = vector.load %arg6[%c0_26, %c0_27, %c0_28] : memref<1x8x1024xf32, #tpu.memory_space<vmem>>, vector<1x8x1024xf32>
    %119 = vector.shape_cast %118 : vector<1x8x1024xf32> to vector<8x1024xf32>
    %120 = vector.shape_cast %117 : vector<8x1024xf32> to vector<1x8x1024xf32>
    tpu.vector_store %arg6[%c0_26, %c0_27, %c0_28], %120 {strides = array<i32>} : memref<1x8x1024xf32, #tpu.memory_space<vmem>>, vector<1x8x1024xf32>,
    return
  }
  func.func @transform_0(%arg0: i32) -> (i32, i32, i32, i32) {
    %c0_i32 = arith.constant 0 : i32
    %c0_i32_0 = arith.constant 0 : i32
    %c0_i32_1 = arith.constant 0 : i32
    %c0_i32_2 = arith.constant 0 : i32
    return %arg0, %c0_i32, %c0_i32_0, %c0_i32_1 : i32, i32, i32, i32
  }
  func.func @transform_1(%arg0: i32) -> (i32, i32, i32, i32) {
    %c0_i32 = arith.constant 0 : i32
    %c0_i32_0 = arith.constant 0 : i32
    %c0_i32_1 = arith.constant 0 : i32
    %c0_i32_2 = arith.constant 0 : i32
    return %arg0, %c0_i32, %c0_i32_0, %c0_i32_1 : i32, i32, i32, i32
  }
  func.func @transform_2(%arg0: i32) -> (i32, i32, i32, i32) {
    %c0_i32 = arith.constant 0 : i32
    %c0_i32_0 = arith.constant 0 : i32
    %c0_i32_1 = arith.constant 0 : i32
    %c0_i32_2 = arith.constant 0 : i32
    return %arg0, %c0_i32, %c0_i32_0, %c0_i32_1 : i32, i32, i32, i32
  }
  func.func @transform_3(%arg0: i32) -> (i32, i32, i32, i32, i32) {
    %c0_i32 = arith.constant 0 : i32
    %c0_i32_0 = arith.constant 0 : i32
    %c0_i32_1 = arith.constant 0 : i32
    %c0_i32_2 = arith.constant 0 : i32
    %c0_i32_3 = arith.constant 0 : i32
    return %arg0, %c0_i32, %c0_i32_0, %c0_i32_1, %c0_i32_2 : i32, i32, i32, i32, i32
  }
  func.func @transform_4(%arg0: i32) -> (i32, i32, i32) {
    %c0_i32 = arith.constant 0 : i32
    %c0_i32_0 = arith.constant 0 : i32
    %c0_i32_1 = arith.constant 0 : i32
    return %arg0, %c0_i32, %c0_i32_0 : i32, i32, i32
  }
  func.func @transform_5(%arg0: i32) -> (i32, i32, i32) {
    %c0_i32 = arith.constant 0 : i32
    %c0_i32_0 = arith.constant 0 : i32
    %c0_i32_1 = arith.constant 0 : i32
    return %arg0, %c0_i32, %c0_i32_0 : i32, i32, i32
  }
}

</mosaic_0001>

<bundles_post_ra>
// kernel: tpu_custom_call.1
= control target key start
LH: loop header
LB: loop body
LE: loop exit
PB: predicated region body
PF: predicated region fallthrough
CT: control target
= control target key end

     0   :  { %s4716_s0 = inlined_call_operand.hbm [shape: f32[2,4,8,32], index: 0, kind: input, shape index: {}]   ;;  %s4717_s1 = inlined_call_operand.hbm [shape: f32[2,4,8,32], index: 1, kind: input, shape index: {}]   ;;  %s4718_s2 = inlined_call_operand.hbm [shape: f32[2,4,8,32], index: 2, kind: input, shape index: {}]   ;;  %s4719_s3 = inlined_call_operand.hbm [shape: f32[2,4,8,8,32], index: 3, kind: input, shape index: {}]   ;;  %s4720_s4 = inlined_call_operand.hbm [shape: f32[2,8,128], index: 4, kind: output, shape index: {0}]   ;;  %s4721_s5 = inlined_call_operand.hbm [shape: f32[2,8,1024], index: 5, kind: output, shape index: {1}]  }
   0x1   :  { %4771 = sst [smem:[#allocation61_spill]] %s4716_s0 }
   0x2   :  { %4772 = sst [smem:[#allocation62_spill]] %s4717_s1 }
   0x3   :  { %11 = vsyncpa [#allocation3], 0 }
   0x4   :  { %13 = vsyncpa [#allocation3 + $0x1], 0 }
   0x5   :  { %14 = vsyncpa [#allocation6], 0 }
   0x6   :  { %16 = vsyncpa [#allocation6 + $0x1], 0 }
   0x7   :  { %17 = vsyncpa [#allocation9], 0 }
   0x8   :  { %19 = vsyncpa [#allocation9 + $0x1], 0 }
   0x9   :  { %20 = vsyncpa [#allocation4], 0 }
   0xa   :  { %22 = vsyncpa [#allocation4 + $0x1], 0 }
   0xb   :  { %23 = vsyncpa [#allocation12], 0 }
   0xc   :  { %25 = vsyncpa [#allocation12 + $0x1], 0  ;;  %s3341_s18 = smov 0   ;;  %s3343_s19 = smov 0  }
   0xd   :  { %s3345_s20 = smov 0   ;;  %s3347_s21 = smov 0  }
   0xe LB: > { %4773 = sst [smem:[#allocation18_spill]] %s3290_s20  ;;  %s3362_s22 = sadd.s32 4294967295, %s3294_s21   ;;  %s3294_s21 = sphi %s3347_s21, %s4872_s21   ;;  %s3290_s20 = sphi %s3345_s20, %s4874_s20   ;;  %s3286_s19 = sphi %s3343_s19, %s4876_s19   ;;  %s3282_s18 = sphi %s3341_s18, %s4875_s18  }
   0xf   : > { %s2861_s23 = sadd.s32 4294967294, %s3294_s21   ;;  %s3366_s24 = sadd.s32 1, %s3294_s21  }
  0x10   : > { %4774 = sst [smem:[#allocation19_spill]] %s3366_s24  ;;  %s38_s25 = sadd.s32 1, %s3290_s20 }
  0x11   : > { %s35_s26 = ssub.s32 %s3294_s21, %s3366_s24  ;;  %p45_p0 = scmp.ne.s32.totalorder %s3290_s20, %s3286_s19 }
  0x12   : > { %p36_p1 = scmp.eq.s32.totalorder %s35_s26, 0  ;;  %p46_p2 = scmp.eq.s32.totalorder %s3294_s21, 0 }
  0x13   : > { %p51_p3 = scmp.ne.s32.totalorder %s3286_s19, %s3282_s18  ;;  %p52_p4 = scmp.eq.s32.totalorder %s3362_s22, 0 }
  0x14   : > { %s3378_s27 = scalar_select %p36_p1, %s3290_s20, %s38_s25  }
  0x15   : > { %p47_p5 = por %p46_p2, %p45_p0  ;;  %p3380_p6 = por %p52_p4, %p51_p3 }
  0x16   : > { %4775 = sst [smem:[#allocation20_spill]] %s3378_s27  ;;  %p153_p7 = scmp.eq.s32.totalorder %s3362_s22, 1 }
  0x17   : > { %s4776_s28 = scalar_select %p3380_p6, 1, 0 }
  0x18   : > { %p159_p8 = scmp.eq.s32.totalorder %s2861_s23, 1  ;;  %p2959_p10 = scmp.lt.s32.totalorder %s3294_s21, 2 }
  0x19   : > { %p3387_p11 = por %p153_p7, %p45_p0  ;;  %s3396_s6 = sand.u32 1, %s3290_s20  }
  0x1a   : > { %p3391_p12 = por %p159_p8, %p51_p3  ;;  %s3399_s7 = sshll.u32 %s3294_s21, 9 }
  0x1b   : > { %s4777_s29 = scalar_select %p3387_p11, 1, 0 }
  0x1c   : > { %s4778_s30 = scalar_select %p3391_p12, 1, 0 }
  0x1d   : > { %s3402_s8 = sshll.u32 %s3396_s6, 5  ;;  %p3404_p13 = pnand %p2959_p10, %p47_p5 }
  0x1e   : > { %s226_s10 = sand.u32 1, %s3294_s21   ;;  %s4780_s1 = sld [smem:[#allocation62_spill]] }
  0x1f   : > { %s230_s14 = scalar_lea.vmem [#allocation5], %s3402_s8  ;;  %s3419_s16 = scalar_lea.sflag [#allocation6], %s226_s10 }
  0x20   : > { %s237_s15 = sshll.u32 %s230_s14, 4  ;;  %p3425_p2 = pneg %p3404_p13  ;;  %s3416_s15 = int_to_ptr.vmem [resolvable:$true] %s237_s15 }
  0x24   : > { %s3413_s13 = scalar_lea.hbm %s4780_s1, %s3399_s7  ;;  %s3085_s11 = scalar_lea.hbm %s4780_s1, 1024 }
  0x25   : > { %s3080_s17 = scalar_lea.hbm %s3413_s13, 512  ;;  %p3086_p5 = scmp.lt.s32.totalorder %s3413_s13, %s4780_s1 }
  0x26   : > { %p3081_p1 = scmp.ne.s32.totalorder %s3413_s13, %s3080_s17  ;;  %p3087_p7 = scmp.lt.s32.totalorder %s3085_s11, %s3080_s17 }
  0x28   : > { %p3083_p3 = pnand %p3425_p2, %p3081_p1  ;;  %p3088_p8 = por %p3087_p7, %p3086_p5 }
  0x2a   : > { %p3084_p4 = pneg %p3083_p3 }
  0x2c   : > { %p3089_p10 = pnand %p3088_p8, %p3084_p4 }
  0x2e   : > { %3092 = shalt.err (!%p3089_p10)
}
  0x2f   : > { %s3093_s10 = scalar_lea.vmem %s3416_s15, 512  ;;  %s3296_s27 = smov [#allocation5]  }
  0x30   : > { %p3094_p9 = scmp.ne.s32.totalorder %s3416_s15, %s3093_s10  ;;  %s3098_s25 = sshll.u32 %s3296_s27, 4  ;;  %s3099_s25 = int_to_ptr.vmem [resolvable:$false] %s3098_s25 }
  0x31   : > { %s3100_s26 = scalar_lea.vmem %s3099_s25, 1024  ;;  %p3101_p0 = scmp.lt.s32.totalorder %s3416_s15, %s3099_s25 }
  0x32   : > { %p3096_p1 = pnand %p3094_p9, %p3425_p2  ;;  %p3102_p12 = scmp.lt.s32.totalorder %s3100_s26, %s3093_s10 }
  0x34   : > { %p3097_p3 = pneg %p3096_p1  ;;  %p3103_p11 = por %p3102_p12, %p3101_p0 }
  0x36   : > { %p3104_p6 = pnand %p3103_p11, %p3097_p3 }
  0x38   : > { %3107 = shalt.err (!%p3104_p6)
}
  0x39   : > { %s4724_s17 = smov 128   ;;  %s4726_s11 = smov 8  }
  0x3a   : > { %2945 = dma.hbm_to_vmem [thread:$0]  (!%p3404_p13), %s3413_s13, 512, %s3416_s15, %s3419_s16, %s4724_s17, %s4724_s17, %s4726_s11  }
  0x3b   : > { %p287_p9 = scmp.lt.s32.totalorder %s3294_s21, 3  ;;  %s4782_s0 = sld [smem:[#allocation61_spill]] }
  0x3c   : > { %p4783_p6 = scmp.ge.s32.totalorder %s3294_s21, 1  ;;  %s209_s25 = scalar_lea.vmem [#allocation2], %s3402_s8 }
  0x3d   : > { %s216_s26 = sshll.u32 %s209_s25, 4  ;;  %s206_s1 = scalar_lea.sflag [#allocation3], %s3396_s6  ;;  %s3465_s26 = int_to_ptr.vmem [resolvable:$true] %s216_s26 }
  0x3e   : > { %p3460_p11 = pnand %p4783_p6, %p287_p9 }
  0x40   : > { %s4784_s10 = scalar_select %p3460_p11, 1, 0 }
  0x41   : > { %s3456_s14 = scalar_lea.hbm %s4782_s0, %s3399_s7  ;;  %s3113_s12 = scalar_lea.hbm %s4782_s0, 1024 }
  0x42   : > { %s3108_s13 = scalar_lea.hbm %s3456_s14, 512  ;;  %p3114_p5 = scmp.lt.s32.totalorder %s3456_s14, %s4782_s0 }
  0x43   : > { %p3109_p12 = scmp.ne.s32.totalorder %s3456_s14, %s3108_s13  ;;  %p3115_p7 = scmp.lt.s32.totalorder %s3113_s12, %s3108_s13 }
  0x45   : > { %p3111_p0 = pnand %p3109_p12, %p3425_p2  ;;  %p3116_p8 = por %p3115_p7, %p3114_p5 }
  0x47   : > { %p3112_p4 = pneg %p3111_p0 }
  0x49   : > { %p3117_p10 = pnand %p3116_p8, %p3112_p4 }
  0x4b   : > { %3120 = shalt.err (!%p3117_p10)
}
  0x4c   : > { %s3121_s25 = scalar_lea.vmem %s3465_s26, 512  ;;  %s3299_s20 = smov [#allocation2]  }
  0x4d   : > { %p3122_p1 = scmp.ne.s32.totalorder %s3465_s26, %s3121_s25  ;;  %s3126_s15 = sshll.u32 %s3299_s20, 4  ;;  %s3127_s15 = int_to_ptr.vmem [resolvable:$false] %s3126_s15 }
  0x4e   : > { %s3128_s27 = scalar_lea.vmem %s3127_s15, 1024  ;;  %p3129_p6 = scmp.lt.s32.totalorder %s3465_s26, %s3127_s15 }
  0x4f   : > { %p3124_p3 = pnand %p3122_p1, %p3425_p2  ;;  %p3130_p12 = scmp.lt.s32.totalorder %s3128_s27, %s3121_s25 }
  0x51   : > { %p3125_p9 = pneg %p3124_p3  ;;  %p3131_p0 = por %p3130_p12, %p3129_p6 }
  0x53   : > { %p3132_p11 = pnand %p3131_p0, %p3125_p9 }
  0x55   : > { %3135 = shalt.err (!%p3132_p11)
}
  0x56   : > { %s4785_s17 = smov 8   ;;  %s4786_s11 = smov 128  }
  0x57   : > { %2942 = dma.hbm_to_vmem [thread:$0]  (!%p3404_p13), %s3456_s14, 512, %s3465_s26, %s206_s1, %s4786_s11, %s4786_s11, %s4785_s17  }
  0x58   : > { %s3495_s12 = scalar_lea.hbm %s4718_s2, %s3399_s7  ;;  %s251_s25 = scalar_lea.vmem [#allocation7], %s3402_s8 }
  0x59   : > { %s258_s15 = sshll.u32 %s251_s25, 4  ;;  %s3136_s27 = scalar_lea.hbm %s3495_s12, 512  ;;  %s259_s15 = int_to_ptr.vmem [resolvable:$true] %s258_s15 }
  0x5a   : > { %p3137_p11 = scmp.ne.s32.totalorder %s3495_s12, %s3136_s27  ;;  %s3141_s1 = scalar_lea.hbm %s4718_s2, 1024 }
  0x5b   : > { %p3142_p7 = scmp.lt.s32.totalorder %s3495_s12, %s4718_s2  ;;  %p3143_p8 = scmp.lt.s32.totalorder %s3141_s1, %s3136_s27 }
  0x5c   : > { %p3139_p4 = pnand %p3137_p11, %p3425_p2 }
  0x5d   : > { %p3144_p10 = por %p3143_p8, %p3142_p7 }
  0x5e   : > { %p3140_p5 = pneg %p3139_p4 }
  0x60   : > { %p3145_p1 = pnand %p3144_p10, %p3140_p5 }
  0x62   : > { %3148 = shalt.err (!%p3145_p1)
}
  0x63   : > { %s3149_s7 = scalar_lea.vmem %s259_s15, 512  ;;  %s3300_s8 = smov [#allocation7]  }
  0x64   : > { %p3150_p3 = scmp.ne.s32.totalorder %s259_s15, %s3149_s7  ;;  %s3154_s13 = sshll.u32 %s3300_s8, 4  ;;  %s3155_s13 = int_to_ptr.vmem [resolvable:$false] %s3154_s13 }
  0x65   : > { %s3156_s20 = scalar_lea.vmem %s3155_s13, 1024  ;;  %p3157_p12 = scmp.lt.s32.totalorder %s259_s15, %s3155_s13 }
  0x66   : > { %p3152_p9 = pnand %p3150_p3, %p3425_p2  ;;  %p3158_p0 = scmp.lt.s32.totalorder %s3156_s20, %s3149_s7 }
  0x68   : > { %p3153_p6 = pneg %p3152_p9  ;;  %p3159_p11 = por %p3158_p0, %p3157_p12 }
  0x6a   : > { %p3160_p4 = pnand %p3159_p11, %p3153_p6 }
  0x6c   : > { %3163 = shalt.err (!%p3160_p4)
}
  0x6d   : > { %2948 = dma.hbm_to_vmem [thread:$0]  (!%p3404_p13), %s3495_s12, 512, %s259_s15, %s3419_s16, %s4786_s11, %s4786_s11, %s4785_s17  }
  0x6e   : > { %s2873_s0 = sshll.u32 %s3396_s6, 8  ;;  %s2897_s24 = sshll.u32 %s3294_s21, 12 }
  0x6f   : > { %s3523_s1 = scalar_lea.hbm %s4719_s3, %s2897_s24  ;;  %s272_s14 = scalar_lea.vmem [#allocation8], %s2873_s0 }
  0x70   : > { %s279_s26 = sshll.u32 %s272_s14, 4  ;;  %s269_s7 = scalar_lea.sflag [#allocation9], %s3396_s6  ;;  %s3525_s26 = int_to_ptr.vmem [resolvable:$true] %s279_s26 }
  0x71   : > { %s3164_s8 = scalar_lea.hbm %s3523_s1, 4096  ;;  %s3169_s15 = scalar_lea.hbm %s4719_s3, 8192 }
  0x72   : > { %p3165_p5 = scmp.ne.s32.totalorder %s3523_s1, %s3164_s8  ;;  %p3170_p10 = scmp.lt.s32.totalorder %s3523_s1, %s4719_s3 }
  0x73   : > { %p3171_p1 = scmp.lt.s32.totalorder %s3169_s15, %s3164_s8 }
  0x74   : > { %p3167_p7 = pnand %p3165_p5, %p3425_p2 }
  0x75   : > { %p3172_p3 = por %p3171_p1, %p3170_p10 }
  0x76   : > { %p3168_p8 = pneg %p3167_p7 }
  0x78   : > { %p3173_p9 = pnand %p3172_p3, %p3168_p8 }
  0x7a   : > { %3176 = shalt.err (!%p3173_p9)
}
  0x7b   : > { %s3177_s6 = scalar_lea.vmem %s3525_s26, 4096  ;;  %s3301_s0 = smov [#allocation8]  }
  0x7c   : > { %p3178_p6 = scmp.ne.s32.totalorder %s3525_s26, %s3177_s6  ;;  %s3182_s24 = sshll.u32 %s3301_s0, 4  ;;  %s3183_s24 = int_to_ptr.vmem [resolvable:$false] %s3182_s24 }
  0x7d   : > { %s3184_s25 = scalar_lea.vmem %s3183_s24, 8192  ;;  %p3185_p11 = scmp.lt.s32.totalorder %s3525_s26, %s3183_s24 }
  0x7e   : > { %p3180_p12 = pnand %p3178_p6, %p3425_p2  ;;  %p3186_p4 = scmp.lt.s32.totalorder %s3184_s25, %s3177_s6 }
  0x80   : > { %p3181_p0 = pneg %p3180_p12  ;;  %p3187_p5 = por %p3186_p4, %p3185_p11 }
  0x82   : > { %p3188_p7 = pnand %p3187_p5, %p3181_p0 }
  0x84   : > { %3191 = shalt.err (!%p3188_p7)
}
  0x85   : > { %2951 = dma.hbm_to_vmem [thread:$0]  (!%p3404_p13), %s3523_s1, 4096, %s3525_s26, %s269_s7, %s4786_s11, %s4786_s11, %s4785_s17  }
  0x86   : > { %p4787_p2 = scmp.ne.s32.totalorder %s4784_s10, 0 }
  0x88   : > { %291 = sbr.rel (%p4787_p2) target bundleno = 1375 (0x55f), region = 36 }
  0x8d   : > { %s3554_s23 = sand.u32 1, %s3286_s19   ;;  %p4788_p8 = scmp.ne.s32.totalorder %s4776_s28, 0 }
  0x8e   : > { %s2877_s27 = sshll.u32 %s3554_s23, 5  ;;  %s294_s14 = scalar_lea.sflag [#allocation3], %s3554_s23 }
  0x8f   : > { %s3558_s8 = scalar_lea.vmem [#allocation2], %s2877_s27 }
  0x90   : > { %3261 = dma.done.wait (%p4788_p8), %s294_s14, 512  }
  0x91   : > { %3263 = vsyncadd (%p4788_p8), %s294_s14, 4294966784  ;;  %s302_s9 = sand.u32 1, %s3362_s22   ;;  %s3565_s17 = scalar_lea.vmem [#allocation5], %s2877_s27 }
  0x92   : > { %s303_s10 = scalar_lea.sflag [#allocation6], %s302_s9 }
  0x93   : > { %3265 = dma.done.wait (%p4788_p8), %s303_s10, 1024  }
  0x94   : > { %3267 = vsyncadd (%p4788_p8), %s303_s10, 4294966272  ;;  %s2880_s11 = sshll.u32 %s3554_s23, 8  ;;  %s3572_s1 = scalar_lea.vmem [#allocation7], %s2877_s27 }
  0x95   : > { %s321_s26 = scalar_lea.sflag [#allocation9], %s3554_s23  ;;  %s3575_s7 = scalar_lea.vmem [#allocation8], %s2880_s11 }
  0x96   : > { %3269 = dma.done.wait (%p4788_p8), %s321_s26, 4096  }
  0x97   : > { %3271 = vsyncadd (%p4788_p8), %s321_s26, 4294963200  ;;  %v423_v0 = vlaneseq  ;;  %v3302_v1 = vmov 1966171168   ;;  %v372_v6 = vld [vmem:[%s3558_s8 + $0x8] sm:$0xff]  ;;  %v371_v9 = vld [vmem:[%s3558_s8] sm:$0xff]  ;;  %vm839_vm0 = vcmask 261120  }
  0x98   : > { %v421_v2 = vunpack.c.l.s4 %v3302_v1  ;;  %v419_v11 = vcombine.high %v371_v9, %v371_v9  ;;  %v3595_v12 = vld [vmem:[%s3558_s8 + $0x10] sm:$0xff]  ;;  %v3603_v16 = vld [vmem:[%s3565_s17 + $0x8] sm:$0xff]  ;;  %v468_v17 = vcombine.high %v372_v6, %v372_v6  ;;  %v3609_v22 = vld [vmem:[%s3565_s17] sm:$0xff]  ;;  %vm1130_vm1 = vcmask 1041409   ;;  %s3306_s28 = smov 32   ;;  %s3307_s16 = smov 64  }
  0x99   : > { %v3582_v3 = vshrl.u32 %v423_v0, 7  ;;  %v391_v26 = vld [vmem:[%s3575_s7 + $0x40] sm:$0xff]  ;;  %v3619_v28 = vld [vmem:[%s3565_s17 + $0x10] sm:$0xff]  ;;  %v384_v44 = vld [vmem:[%s3575_s7 + $0x8] sm:$0xff]  ;;  %vm1132_vm2 = vcmask 1042434   ;;  %vm1134_vm3 = vcmask 1043459  }
  0x9a   : > { %v422_v4 = vunpack.c.0.s8 %v421_v2  ;;  %v383_v33 = vld [vmem:[%s3575_s7] sm:$0xff]  ;;  %v385_v49 = vld [vmem:[%s3575_s7 + $0x10] sm:$0xff]  ;;  %v392_v51 = vld [vmem:[%s3575_s7 + $0x48] sm:$0xff]  ;;  %vm1136_vm4 = vcmask 1044484   ;;  %vm1138_vm5 = vcmask 1045509   ;;  %vm1140_vm6 = vcmask 1046534  }
  0x9b   : > { %v3590_v8 = vsub.s32 0, %v3582_v3  ;;  %v399_v38 = vld [vmem:[%s3575_s7 + $0x80] sm:$0xff]  ;;  %v393_v61 = vld [vmem:[%s3575_s7 + $0x50] sm:$0xff]  ;;  %vm1142_vm7 = vcmask 1047559   ;;  %vm1169_vm8 = vcmask 64512   ;;  %vm3305_vm9 = vmmov 0  }
  0x9c   : > { %v3585_v5 = vsub.s32 %v422_v4, %v3582_v3  ;;  %v387_v62 = vld [vmem:[%s3575_s7 + $0x20] sm:$0xff]  ;;  %s3308_s12 = smov 96   ;;  %vm2527_vm10 = vcmask 523264   ;;  %s2882_s15 = sshll.u32 %s3554_s23, 6  ;;  %vm2529_vm11 = vcmask 785408  }
  0x9d   : > { %s4607_s13 = scalar_lea.vmem [#allocation11], %s2882_s15  ;;  %s2881_s20 = sshll.u32 %s3554_s23, 3 }
  0x9e   : > { %v475_v7 = vrot.slane %v372_v6, %v3585_v5  ;;  %v426_v10 = vrot.slane %v371_v9, %v3585_v5  ;;  %v3600_v14 = vrot.slane %v3595_v12, %v3585_v5  ;;  %v433_v20 = vrot.slane %v419_v11, %v3585_v5  ;;  %s2889_s6 = sshll.u32 %s3362_s22, 7  ;;  %s363_s0 = scalar_lea.vmem [#allocation10], %s2881_s20 }
  0x9f   : > { %v482_v46 = vrot.slane %v468_v17, %v3585_v5  ;;  %s2679_s24 = sshll.u32 %s363_s0, 4  ;;  %s4639_s14 = scalar_lea.hbm %s4720_s4, %s2889_s6  ;;  %s4641_s24 = int_to_ptr.vmem [resolvable:$true] %s2679_s24 }
  0xa0   : > { %v491_v13 = vrot.slane %v475_v7, %v3585_v5  ;;  %v483_v15 = vcombine.high %v475_v7, %v475_v7  ;;  %v442_v18 = vrot.slane %v426_v10, %v3585_v5  ;;  %v434_v19 = vcombine.high %v426_v10, %v426_v10  ;;  %s2693_s9 = sshll.u32 %s4607_s13, 4  ;;  %s2661_s10 = scalar_lea.sflag [#allocation4], %s3554_s23  ;;  %s2694_s9 = int_to_ptr.vmem [resolvable:$true] %s2693_s9 }
  0xa1   : > { %v3613_v23 = vrot.slane %v3600_v14, %v3585_v5  ;;  %v449_v31 = vrot.slane %v433_v20, %v3585_v5  ;;  %v3665_v63 = vrot.slane %v482_v46, %v3585_v5  ;;  %v435_v7 = vcombine.high %v433_v20, %v433_v20  ;;  %p4869_p10 = scmp.ne.s32.totalorder %s4777_s29, 0  ;;  %s3309_s11 = smov [#allocation10]  }
  0xa2   : > { %v650_v21 = vrot.slane %v491_v13, %v3590_v8  ;;  %v505_v24 = vrot.slane %v483_v15, %v3585_v5  ;;  %v513_v25 = vcombine.high %v491_v13, %v491_v13  ;;  %v618_v27 = vrot.slane %v442_v18, %v3590_v8 }
  0xa3   : > { %v456_v29 = vrot.slane %v434_v19, %v3585_v5  ;;  %v464_v30 = vcombine.high %v442_v18, %v442_v18  ;;  %v682_v34 = vrot.slane %v3613_v23, %v3590_v8  ;;  %v634_v41 = vrot.slane %v449_v31, %v3590_v8 }
  0xa4   : > { %v783_v32 = vmul.f32 %v650_v21, %v3603_v16  ;;  %v654_v35 = vrot.slane %v505_v24, %v3590_v8  ;;  %v658_v36 = vrot.slane %v513_v25, %v3590_v8  ;;  %v775_v37 = vmul.f32 %v618_v27, %v3609_v22  ;;  %v386_v21 = vld [vmem:[%s3575_s7 + $0x18] sm:$0xff]  ;;  %v395_v27 = vld [vmem:[%s3575_s7 + $0x60] sm:$0xff] }
  0xa5   : > { %v622_v39 = vrot.slane %v456_v29, %v3590_v8  ;;  %v626_v40 = vrot.slane %v464_v30, %v3590_v8  ;;  %v791_v43 = vmul.f32 %v682_v34, %v3619_v28  ;;  %v779_v57 = vmul.f32 %v634_v41, %v3609_v22  ;;  %v394_v41 = vld [vmem:[%s3575_s7 + $0x58] sm:$0xff] }
  0xa6   : > { %v3634_v42 = vmul.f32 %v783_v32, %v391_v26  ;;  %v784_v45 = vmul.f32 %v654_v35, %v3603_v16  ;;  %v3640_v47 = vmul.f32 %v775_v37, %v383_v33  ;;  %v785_v56 = vmul.f32 %v658_v36, %v3603_v16  ;;  %v3699_v32 = vld [vmem:[%s3558_s8 + $0x18] sm:$0xff]  ;;  %s2898_s8 = sshll.u32 %s3362_s22, 10 }
  0xa7   : > { %v776_v48 = vmul.f32 %v622_v39, %v3609_v22  ;;  %v777_v50 = vmul.f32 %v626_v40, %v3609_v22  ;;  %v3648_v53 = vmul.f32 %v791_v43, %v399_v38  ;;  %v466_v2 = vcombine.high %v456_v29, %v456_v29  ;;  %v388_v39 = vld [vmem:[%s3575_s7 + $0x28] sm:$0xff] }
  0xa8   : > { %4789 = vst [vmem:[#allocation21_spill] sm:$0xff] %v3634_v42  ;;  %4790 = vst [vmem:[#allocation22_spill] sm:$0xff] %v3640_v47  ;;  %v864_v52 = vsel %vm839_vm0, %v3634_v42, 0.0  ;;  %v840_v54 = vsel %vm839_vm0, %v3640_v47, 0.0  ;;  %v3660_v60 = vmul.f32 %v784_v45, %v392_v51  ;;  %v666_v4 = vrot.slane %v3665_v63, %v3590_v8 }
  0xa9   : > { %4791 = vst [vmem:[#allocation23_spill] sm:$0xff] %v3648_v53  ;;  %865 = vadd.xlane.f32.xlu1 %v864_v52  ;;  %v3652_v55 = vmul.f32 %v776_v48, %v384_v44  ;;  %841 = vadd.xlane.f32.xlu0 %v840_v54  ;;  %v888_v58 = vsel %vm839_vm0, %v3648_v53, 0.0  ;;  %v3658_v59 = vmul.f32 %v777_v50, %v385_v49 }
  0xaa   : > { %4794 = vst [vmem:[#allocation26_spill] sm:$0xff] %v3660_v60  ;;  %v515_v6 = vcombine.high %v505_v24, %v505_v24  ;;  %v532_v9 = vcombine.high %v3600_v14, %v3600_v14  ;;  %v3673_v10 = vmul.f32 %v785_v56, %v393_v61  ;;  %v3675_v11 = vmul.f32 %v779_v57, %v387_v62  ;;  %v389_v56 = vld [vmem:[%s3575_s7 + $0x30] sm:$0xff] }
  0xab   : > { %4792 = vst [vmem:[#allocation24_spill] sm:$0xff] %v3652_v55  ;;  %4793 = vst [vmem:[#allocation25_spill] sm:$0xff] %v3658_v59  ;;  %v843_v1 = vsel %vm839_vm0, %v3652_v55, 0.0  ;;  %v630_v13 = vrot.slane %v466_v2, %v3590_v8  ;;  %v465_v15 = vcombine.high %v449_v31, %v449_v31  ;;  %v846_v17 = vsel %vm839_vm0, %v3658_v59, 0.0 }
  0xac   : > { %4795 = vst [vmem:[#allocation27_spill] sm:$0xff] %v3673_v10  ;;  %4796 = vst [vmem:[#allocation28_spill] sm:$0xff] %v3675_v11  ;;  %v867_v18 = vsel %vm839_vm0, %v3660_v60, 0.0  ;;  %v3683_v19 = vrot.slane %v435_v7, %v3585_v5  ;;  %v484_v14 = vcombine.high %v482_v46, %v482_v46  ;;  %v787_v20 = vmul.f32 %v666_v4, %v3603_v16 }
  0xad   : > { %889 = vadd.xlane.f32.xlu1 %v888_v58  ;;  %844 = vadd.xlane.f32.xlu0 %v843_v1  ;;  %v778_v24 = vmul.f32 %v630_v13, %v3609_v22  ;;  %v662_v25 = vrot.slane %v515_v6, %v3590_v8  ;;  %v3690_v26 = vrot.slane %v532_v9, %v3585_v5  ;;  %v852_v33 = vsel %vm839_vm0, %v3675_v11, 0.0  ;;  %v400_v58 = vld [vmem:[%s3575_s7 + $0x88] sm:$0xff]  ;;  %v401_v9 = vld [vmem:[%s3575_s7 + $0x90] sm:$0xff] }
  0xae   : > { %v638_v29 = vrot.slane %v3683_v19, %v3590_v8  ;;  %v642_v30 = vrot.slane %v465_v15, %v3590_v8  ;;  %v562_v31 = vcombine.high %v3613_v23, %v3613_v23  ;;  %v3707_v36 = vrot.slane %v484_v14, %v3585_v5  ;;  %v396_v14 = vld [vmem:[%s3575_s7 + $0x68] sm:$0xff] }
  0xaf   : > { %v3703_v34 = vmul.f32 %v778_v24, %v386_v21  ;;  %v870_v37 = vsel %vm839_vm0, %v3673_v10, 0.0  ;;  %v3711_v38 = vmul.f32 %v787_v20, %v395_v27  ;;  %v786_v23 = vmul.f32 %v662_v25, %v3603_v16 }
  0xb0   : > { %v780_v35 = vmul.f32 %v638_v29, %v3609_v22  ;;  %v686_v40 = vrot.slane %v3690_v26, %v3590_v8  ;;  %v573_v43 = vrot.slane %v3699_v32, %v3585_v5  ;;  %v781_v44 = vmul.f32 %v642_v30, %v3609_v22 }
  0xb1   : > { %847 = vadd.xlane.f32.xlu1 %v846_v17  ;;  %868 = vadd.xlane.f32.xlu0 %v867_v18  ;;  %4797 = vst [vmem:[#allocation29_spill] sm:$0xff] %v3703_v34  ;;  %4798 = vst [vmem:[#allocation30_spill] sm:$0xff] %v3711_v38  ;;  %v690_v45 = vrot.slane %v562_v31, %v3590_v8  ;;  %v849_v46 = vsel %vm839_vm0, %v3703_v34, 0.0  ;;  %v670_v49 = vrot.slane %v3707_v36, %v3590_v8 }
  0xb2   : > { %v3724_v48 = vmul.f32 %v780_v35, %v388_v39  ;;  %v581_v50 = vcombine.high %v573_v43, %v573_v43  ;;  %v876_v51 = vsel %vm839_vm0, %v3711_v38, 0.0  ;;  %v3730_v52 = vmul.f32 %v786_v23, %v394_v41  ;;  %v408_v35 = vld [vmem:[%s3575_s7 + $0xc8] sm:$0xff]  ;;  %v407_v23 = vld [vmem:[%s3575_s7 + $0xc0] sm:$0xff] }
  0xb3   : > { %v792_v54 = vmul.f32 %v686_v40, %v3619_v28  ;;  %v589_v57 = vrot.slane %v573_v43, %v3585_v5  ;;  %v793_v62 = vmul.f32 %v690_v45, %v3619_v28  ;;  %v514_v1 = vcombine.high %v3665_v63, %v3665_v63  ;;  %v3757_v63 = vld [vmem:[%s3565_s17 + $0x18] sm:$0xff]  ;;  %s3192_s17 = scalar_lea.vmem %s4641_s24, 128 }
  0xb4   : > { %4799 = vst [vmem:[#allocation31_spill] sm:$0xff] %v3724_v48  ;;  %4800 = vst [vmem:[#allocation32_spill] sm:$0xff] %v3730_v52  ;;  %v3737_v61 = vrot.slane %v581_v50, %v3585_v5  ;;  %v517_v2 = vcombine.high %v3595_v12, %v3595_v12  ;;  %v855_v4 = vsel %vm839_vm0, %v3724_v48, 0.0  ;;  %v3746_v6 = vmul.f32 %v781_v44, %v389_v56  ;;  %v397_v44 = vld [vmem:[%s3575_s7 + $0x70] sm:$0xff]  ;;  %v390_v56 = vld [vmem:[%s3575_s7 + $0x38] sm:$0xff]  ;;  %p3193_p13 = scmp.ne.s32.totalorder %s4641_s24, %s3192_s17 }
  0xb5   : > { %853 = vadd.xlane.f32.xlu1 %v852_v33  ;;  %871 = vadd.xlane.f32.xlu0 %v870_v37  ;;  %v788_v7 = vmul.f32 %v670_v49, %v3603_v16  ;;  %v873_v15 = vsel %vm839_vm0, %v3730_v52, 0.0  ;;  %v3754_v17 = vmul.f32 %v792_v54, %v400_v58  ;;  %v714_v12 = vrot.slane %v589_v57, %v3590_v8 }
  0xb6   : > { %4801 = vst [vmem:[#allocation33_spill] sm:$0xff] %v3746_v6  ;;  %v718_v13 = vrot.slane %v3737_v61, %v3590_v8  ;;  %v467_v18 = vcombine.high %v3683_v19, %v3683_v19  ;;  %v3763_v20 = vmul.f32 %v793_v62, %v401_v9  ;;  %v674_v21 = vrot.slane %v514_v1, %v3590_v8  ;;  %v409_v9 = vld [vmem:[%s3575_s7 + $0xd0] sm:$0xff]  ;;  %p3194_p1 = pnand %p3193_p13, %p4869_p10 }
  0xb7   : > { %4802 = vst [vmem:[#allocation34_spill] sm:$0xff] %v3754_v17  ;;  %v531_v24 = vrot.slane %v517_v2, %v3585_v5  ;;  %v858_v25 = vsel %vm839_vm0, %v3746_v6, 0.0  ;;  %v611_v29 = vcombine.high %v589_v57, %v589_v57  ;;  %v564_v19 = vcombine.high %v3690_v26, %v3690_v26 }
  0xb8   : > { %4803 = vst [vmem:[#allocation35_spill] sm:$0xff] %v3763_v20  ;;  %v800_v27 = vmul.f32 %v718_v13, %v3757_v63  ;;  %v891_v30 = vsel %vm839_vm0, %v3754_v17, 0.0  ;;  %v3774_v31 = vmul.f32 %v788_v7, %v396_v14  ;;  %v799_v33 = vmul.f32 %v714_v12, %v3757_v63  ;;  %v402_v13 = vld [vmem:[%s3575_s7 + $0x98] sm:$0xff]  ;;  %p3195_p3 = pneg %p3194_p1 }
  0xb9   : > { %850 = vadd.xlane.f32.xlu1 %v849_v46  ;;  %877 = vadd.xlane.f32.xlu0 %v876_v51  ;;  %v646_v37 = vrot.slane %v467_v18, %v3590_v8  ;;  %v894_v39 = vsel %vm839_vm0, %v3763_v20, 0.0  ;;  %v789_v40 = vmul.f32 %v674_v21, %v3603_v16  ;;  %v547_v26 = vrot.slane %v531_v24, %v3585_v5 }
  0xba   : > { %4804 = vst [vmem:[#allocation36_spill] sm:$0xff] %v3774_v31  ;;  %v516_v41 = vcombine.high %v3707_v36, %v3707_v36  ;;  %v3786_v43 = vmul.f32 %v800_v27, %v408_v35  ;;  %v722_v45 = vrot.slane %v611_v29, %v3590_v8  ;;  %v694_v46 = vrot.slane %v564_v19, %v3590_v8  ;;  %v403_v27 = vld [vmem:[%s3575_s7 + $0xa0] sm:$0xff]  ;;  %v398_v29 = vld [vmem:[%s3575_s7 + $0x78] sm:$0xff] }
  0xbb   : > { %v533_v49 = vcombine.high %v531_v24, %v531_v24  ;;  %v879_v50 = vsel %vm839_vm0, %v3774_v31, 0.0  ;;  %v3793_v51 = vmul.f32 %v799_v33, %v407_v23  ;;  %v782_v54 = vmul.f32 %v646_v37, %v3609_v22 }
  0xbc   : > { %4805 = vst [vmem:[#allocation37_spill] sm:$0xff] %v3786_v43  ;;  %v566_v36 = vcombine.high %v3699_v32, %v3699_v32  ;;  %v3799_v57 = vmul.f32 %v789_v40, %v397_v44  ;;  %v698_v58 = vrot.slane %v547_v26, %v3590_v8  ;;  %v678_v62 = vrot.slane %v516_v41, %v3590_v8 }
  0xbd   : > { %856 = vadd.xlane.f32.xlu1 %v855_v4  ;;  %874 = vadd.xlane.f32.xlu0 %v873_v15  ;;  %4806 = vst [vmem:[#allocation38_spill] sm:$0xff] %v3793_v51  ;;  %v915_v1 = vsel %vm839_vm0, %v3786_v43, 0.0  ;;  %v801_v2 = vmul.f32 %v722_v45, %v3757_v63  ;;  %v794_v22 = vmul.f32 %v694_v46, %v3619_v28  ;;  %v912_v4 = vsel %vm839_vm0, %v3793_v51, 0.0  ;;  %v404_v45 = vld [vmem:[%s3575_s7 + $0xa8] sm:$0xff] }
  0xbe   : > { %4807 = vst [vmem:[#allocation39_spill] sm:$0xff] %v3799_v57  ;;  %v561_v32 = vrot.slane %v533_v49, %v3585_v5  ;;  %v3810_v7 = vmul.f32 %v782_v54, %v390_v56  ;;  %v613_v15 = vcombine.high %v3737_v61, %v3737_v61  ;;  %v580_v12 = vrot.slane %v566_v36, %v3585_v5  ;;  %v410_v54 = vld [vmem:[%s3575_s7 + $0xd8] sm:$0xff] }
  0xbf   : > { %v882_v18 = vsel %vm839_vm0, %v3799_v57, 0.0  ;;  %v795_v14 = vmul.f32 %v698_v58, %v3619_v28  ;;  %v790_v21 = vmul.f32 %v678_v62, %v3603_v16  ;;  %v3821_v24 = vmul.f32 %v801_v2, %v409_v9 }
  0xc0   : > { %4808 = vst [vmem:[#allocation40_spill] sm:$0xff] %v3810_v7  ;;  %v702_v61 = vrot.slane %v561_v32, %v3590_v8  ;;  %v563_v19 = vcombine.high %v547_v26, %v547_v26  ;;  %v726_v33 = vrot.slane %v613_v15, %v3590_v8  ;;  %v596_v35 = vrot.slane %v580_v12, %v3585_v5 }
  0xc1   : > { %859 = vadd.xlane.f32.xlu1 %v858_v25  ;;  %892 = vadd.xlane.f32.xlu0 %v891_v30  ;;  %4809 = vst [vmem:[#allocation41_spill] sm:$0xff] %v3821_v24  ;;  %v3823_v25 = vmul.f32 %v794_v22, %v402_v13  ;;  %v861_v30 = vsel %vm839_vm0, %v3810_v7, 0.0  ;;  %v582_v16 = vcombine.high %v580_v12, %v580_v12  ;;  %v411_v13 = vld [vmem:[%s3575_s7 + $0xe0] sm:$0xff] }
  0xc2   : > { %v3832_v37 = vmul.f32 %v795_v14, %v403_v27  ;;  %v3834_v23 = vmul.f32 %v790_v21, %v398_v29  ;;  %v796_v40 = vmul.f32 %v702_v61, %v3619_v28  ;;  %v706_v26 = vrot.slane %v563_v19, %v3590_v8  ;;  %v406_v29 = vld [vmem:[%s3575_s7 + $0xb8] sm:$0xff] }
  0xc3   : > { %4810 = vst [vmem:[#allocation42_spill] sm:$0xff] %v3823_v25  ;;  %v565_v41 = vcombine.high %v561_v32, %v561_v32  ;;  %v897_v44 = vsel %vm839_vm0, %v3823_v25, 0.0  ;;  %v802_v46 = vmul.f32 %v726_v33, %v3757_v63  ;;  %v730_v49 = vrot.slane %v596_v35, %v3590_v8 }
  0xc4   : > { %4811 = vst [vmem:[#allocation43_spill] sm:$0xff] %v3832_v37  ;;  %4812 = vst [vmem:[#allocation44_spill] sm:$0xff] %v3834_v23  ;;  %v900_v36 = vsel %vm839_vm0, %v3832_v37, 0.0  ;;  %v885_v56 = vsel %vm839_vm0, %v3834_v23, 0.0  ;;  %v3851_v58 = vmul.f32 %v796_v40, %v404_v45  ;;  %v797_v62 = vmul.f32 %v706_v26, %v3619_v28  ;;  %v414_v26 = vld [vmem:[%s3575_s7 + $0xf8] sm:$0xff] }
  0xc5   : > { %895 = vadd.xlane.f32.xlu1 %v894_v39  ;;  %880 = vadd.xlane.f32.xlu0 %v879_v50  ;;  %v918_v39 = vsel %vm839_vm0, %v3821_v24, 0.0  ;;  %v610_v50 = vrot.slane %v582_v16, %v3585_v5  ;;  %v3855_v22 = vmul.f32 %v802_v46, %v410_v54  ;;  %v405_v5 = vld [vmem:[%s3575_s7 + $0xb0] sm:$0xff]  ;;  %v803_v32 = vmul.f32 %v730_v49, %v3757_v63 }
  0xc6   : > { %4813 = vst [vmem:[#allocation45_spill] sm:$0xff] %v3851_v58  ;;  %v612_v9 = vcombine.high %v596_v35, %v596_v35  ;;  %v903_v15 = vsel %vm839_vm0, %v3851_v58, 0.0  ;;  %v3863_v12 = vmul.f32 %v797_v62, %v405_v5 }
  0xc7   : > { %v614_v2 = vcombine.high %v610_v50, %v610_v50  ;;  %4814 = vst [vmem:[#allocation46_spill] sm:$0xff] %v3855_v22  ;;  %v921_v21 = vsel %vm839_vm0, %v3855_v22, 0.0  ;;  %v3869_v27 = vmul.f32 %v803_v32, %v411_v13 }
  0xc8   : > { %4815 = vst [vmem:[#allocation47_spill] sm:$0xff] %v3863_v12  ;;  %v738_v19 = vrot.slane %v612_v9, %v3590_v8 }
  0xc9   : > { %916 = vadd.xlane.f32.xlu1 %v915_v1  ;;  %913 = vadd.xlane.f32.xlu0 %v912_v4  ;;  %v710_v1 = vrot.slane %v565_v41, %v3590_v8  ;;  %v734_v4 = vrot.slane %v610_v50, %v3590_v8  ;;  %v742_v14 = vrot.slane %v614_v2, %v3590_v8  ;;  %v924_v16 = vsel %vm839_vm0, %v3869_v27, 0.0  ;;  %v413_v41 = vld [vmem:[%s3575_s7 + $0xf0] sm:$0xff] }
  0xca   : > { %4816 = vst [vmem:[#allocation48_spill] sm:$0xff] %v3869_v27  ;;  %v805_v40 = vmul.f32 %v738_v19, %v3757_v63 }
  0xcb   : > { %v804_v61 = vmul.f32 %v734_v4, %v3757_v63  ;;  %v806_v35 = vmul.f32 %v742_v14, %v3757_v63 }
  0xcc   : > { %v3893_v49 = vmul.f32 %v805_v40, %v413_v41 }
  0xcd   : > { %883 = vadd.xlane.f32.xlu1 %v882_v18  ;;  %862 = vadd.xlane.f32.xlu0 %v861_v30  ;;  %v798_v18 = vmul.f32 %v710_v1, %v3619_v28  ;;  %v412_v30 = vld [vmem:[%s3575_s7 + $0xe8] sm:$0xff]  ;;  %v906_v28 = vsel %vm839_vm0, %v3863_v12, 0.0  ;;  %v3889_v45 = vmul.f32 %v806_v35, %v414_v26 }
  0xce   : > { %4820 = vst [vmem:[#allocation52_spill] sm:$0xff] %v3893_v49  ;;  %v930_v63 = vsel %vm839_vm0, %v3893_v49, 0.0 }
  0xcf   : > { %v3877_v33 = vmul.f32 %v798_v18, %v406_v29  ;;  %4819 = vst [vmem:[#allocation51_spill] sm:$0xff] %v3889_v45  ;;  %v933_v50 = vsel %vm839_vm0, %v3889_v45, 0.0  ;;  %v1001_v18 = vand.u32 127, %v423_v0 }
  0xd1   : > { %919 = vadd.xlane.f32.xlu1 %v918_v39  ;;  %898 = vadd.xlane.f32.xlu0 %v897_v44  ;;  %4817 = vst [vmem:[#allocation49_spill] sm:$0xff] %v3877_v33  ;;  %v3882_v39 = vmul.f32 %v804_v61, %v412_v30  ;;  %v909_v44 = vsel %vm839_vm0, %v3877_v33, 0.0  ;;  %v3907_v19 = vsub.s32 %v1001_v18, %v3582_v3 }
  0xd3   : > { %4818 = vst [vmem:[#allocation50_spill] sm:$0xff] %v3882_v39  ;;  %v927_v46 = vsel %vm839_vm0, %v3882_v39, 0.0 }
  0xd5   : > { %901 = vadd.xlane.f32.xlu1 %v900_v36  ;;  %886 = vadd.xlane.f32.xlu0 %v885_v56 }
  0xd9   : > { %904 = vadd.xlane.f32.xlu1 %v903_v15  ;;  %922 = vadd.xlane.f32.xlu0 %v921_v21 }
  0xdd   : > { %907 = vadd.xlane.f32.xlu1 %v906_v28  ;;  %925 = vadd.xlane.f32.xlu0 %v924_v16 }
  0xe1   : > { %910 = vadd.xlane.f32.xlu1 %v909_v44  ;;  %928 = vadd.xlane.f32.xlu0 %v927_v46 }
  0xe5   : > { %934 = vadd.xlane.f32.xlu1 %v933_v50  ;;  %931 = vadd.xlane.f32.xlu0 %v930_v63 }
 0x132   : > { %v866_v54 = vpop.xlane.xlu1 %865  ;;  %v842_v36 = vpop.xlane.xlu0 %841 }
 0x133   : > { %v3909_v30 = vmul.f32 0.17677669, %v842_v36 }
 0x135   : > { %v1005_v41 = vrot.slane %v3909_v30, %v3907_v19 }
 0x136   : > { %v3899_v56 = vpop.xlane.xlu1 %889  ;;  %v845_v62 = vpop.xlane.xlu0 %844 }
 0x137   : > { %v3902_v29 = vmul.f32 0.17677669, %v845_v62  ;;  %v3929_v62 = vmul.f32 0.17677669, %v866_v54 }
 0x139   : > { %v1009_v40 = vrot.slane %v3902_v29, %v3907_v19 }
 0x13a   : > { %v848_v1 = vpop.xlane.xlu1 %847  ;;  %v869_v2 = vpop.xlane.xlu0 %868 }
 0x13b   : > { %v3904_v61 = vmul.f32 0.17677669, %v848_v1  ;;  %v1131_v1 = vsel %vm1130_vm1, %v1009_v40, %v1005_v41 }
 0x13d   : > { %v1013_v0 = vrot.slane %v3904_v61, %v3907_v19 }
 0x13e   : > { %v854_v5 = vpop.xlane.xlu1 %853  ;;  %v872_v32 = vpop.xlane.xlu0 %871 }
 0x13f   : > { %v3917_v26 = vmul.f32 0.17677669, %v854_v5  ;;  %v3932_v5 = vmul.f32 0.17677669, %v869_v2  ;;  %v3935_v18 = vmul.f32 0.17677669, %v872_v32  ;;  %v1037_v32 = vrot.slane %v3929_v62, %v3907_v19 }
 0x142   : > { %v851_v4 = vpop.xlane.xlu1 %850  ;;  %v878_v9 = vpop.xlane.xlu0 %877 }
 0x143   : > { %v3911_v28 = vmul.f32 0.17677669, %v851_v4  ;;  %v1133_v4 = vsel %vm1132_vm2, %v1013_v0, %v1131_v1  ;;  %v1041_v0 = vrot.slane %v3932_v5, %v3907_v19  ;;  %v3962_v59 = vmul.f32 0.17677669, %v878_v9 }
 0x145   : > { %v1017_v44 = vrot.slane %v3911_v28, %v3907_v19 }
 0x146   : > { %v857_v13 = vpop.xlane.xlu1 %856  ;;  %v875_v15 = vpop.xlane.xlu0 %874 }
 0x147   : > { %v3923_v46 = vmul.f32 0.17677669, %v857_v13  ;;  %v1021_v13 = vrot.slane %v3917_v26, %v3907_v19  ;;  %v1135_v45 = vsel %vm1134_vm3, %v1017_v44, %v1133_v4  ;;  %v3940_v49 = vmul.f32 0.17677669, %v875_v15 }
 0x148   : > { %v1045_v15 = vrot.slane %v3935_v18, %v3907_v19 }
 0x149   : > { %v1137_v44 = vsel %vm1136_vm4, %v1021_v13, %v1135_v45  ;;  %v1049_v1 = vrot.slane %v3940_v49, %v3907_v19  ;;  %v1144_v13 = vsel %vm1130_vm1, %v1041_v0, %v1037_v32 }
 0x14a   : > { %v860_v14 = vpop.xlane.xlu1 %859  ;;  %v893_v21 = vpop.xlane.xlu0 %892 }
 0x14b   : > { %v3927_v63 = vmul.f32 0.17677669, %v860_v14  ;;  %v1025_v14 = vrot.slane %v3923_v46, %v3907_v19 }
 0x14d   : > { %v1029_v2 = vrot.slane %v3927_v63, %v3907_v19 }
 0x14e   : > { %v896_v35 = vpop.xlane.xlu1 %895  ;;  %v881_v16 = vpop.xlane.xlu0 %880 }
 0x14f   : > { %v3957_v4 = vmul.f32 0.17677669, %v881_v16  ;;  %v1145_v16 = vsel %vm1132_vm2, %v1045_v15, %v1144_v13  ;;  %v3984_v15 = vmul.f32 0.17677669, %v3899_v56 }
 0x150   : > { %v1146_v7 = vsel %vm1134_vm3, %v1049_v1, %v1145_v16 }
 0x152   : > { %v3925_v50 = vpop.xlane.xlu1 %916  ;;  %v914_v36 = vpop.xlane.xlu0 %913 }
 0x156   : > { %v884_v54 = vpop.xlane.xlu1 %883  ;;  %v863_v40 = vpop.xlane.xlu0 %862 }
 0x157   : > { %v3950_v41 = vmul.f32 0.17677669, %v863_v40  ;;  %v1139_v40 = vsel %vm1138_vm5, %v1025_v14, %v1137_v44  ;;  %v3964_v34 = vmul.f32 0.17677669, %v884_v54  ;;  %v1057_v14 = vrot.slane %v3957_v4, %v3907_v19 }
 0x158   : > { %v1141_v45 = vsel %vm1140_vm6, %v1029_v2, %v1139_v40  ;;  %v1053_v54 = vrot.slane %v3962_v59, %v3907_v19  ;;  %v3986_v44 = vmul.f32 0.17677669, %v896_v35 }
 0x159   : > { %v1033_v11 = vrot.slane %v3950_v41, %v3907_v19  ;;  %v1061_v2 = vrot.slane %v3964_v34, %v3907_v19 }
 0x15a   : > { %v920_v48 = vpop.xlane.xlu1 %919  ;;  %v899_v47 = vpop.xlane.xlu0 %898 }
 0x15b   : > { %v1143_v55 = vsel %vm1142_vm7, %v1033_v11, %v1141_v45  ;;  %v3980_v11 = vmul.f32 0.17677669, %v893_v21  ;;  %v3991_v45 = vmul.f32 0.17677669, %v899_v47  ;;  %v1077_v47 = vrot.slane %v3986_v44, %v3907_v19 }
 0x15c   : > { %v1170_v6 = vsel %vm1169_vm8, %v1143_v55, -inf  ;;  %v1147_v55 = vsel %vm1136_vm4, %v1053_v54, %v1146_v7 }
 0x15d   : > { %1171 = vmax.xlane.f32.xlu0 %v1170_v6  ;;  %v1148_v40 = vsel %vm1138_vm5, %v1057_v14, %v1147_v55  ;;  %v1073_v56 = vrot.slane %v3980_v11, %v3907_v19  ;;  %v1081_v55 = vrot.slane %v3991_v45, %v3907_v19 }
 0x15e   : > { %v902_v9 = vpop.xlane.xlu1 %901  ;;  %v887_v32 = vpop.xlane.xlu0 %886  ;;  %v1149_v16 = vsel %vm1140_vm6, %v1061_v2, %v1148_v40  ;;  %v4006_v2 = vmul.f32 0.17677669, %v914_v36  ;;  %v4015_v40 = vmul.f32 0.17677669, %v920_v48 }
 0x15f   : > { %v3978_v0 = vmul.f32 0.17677669, %v887_v32  ;;  %v3994_v21 = vmul.f32 0.17677669, %v902_v9  ;;  %v1069_v32 = vrot.slane %v3984_v15, %v3907_v19  ;;  %v4009_v9 = vmul.f32 0.17677669, %v3925_v50 }
 0x160   : > { %v1101_v48 = vrot.slane %v4006_v2, %v3907_v19 }
 0x161   : > { %v1065_v6 = vrot.slane %v3978_v0, %v3907_v19  ;;  %v1105_v39 = vrot.slane %v4009_v9, %v3907_v19 }
 0x162   : > { %v905_v1 = vpop.xlane.xlu1 %904  ;;  %v923_v13 = vpop.xlane.xlu0 %922 }
 0x163   : > { %v1150_v7 = vsel %vm1142_vm7, %v1065_v6, %v1149_v16  ;;  %v3999_v35 = vmul.f32 0.17677669, %v905_v1  ;;  %v1085_v16 = vrot.slane %v3994_v21, %v3907_v19  ;;  %v1158_v43 = vsel %vm1130_vm1, %v1105_v39, %v1101_v48 }
 0x164   : > { %v1173_v54 = vsel %vm1169_vm8, %v1150_v7, -inf  ;;  %v1151_v7 = vsel %vm1130_vm1, %v1073_v56, %v1069_v32 }
 0x165   : > { %1174 = vmax.xlane.f32.xlu1 %v1173_v54  ;;  %v1089_v36 = vrot.slane %v3999_v35, %v3907_v19  ;;  %v4022_v54 = vmul.f32 0.17677669, %v923_v13  ;;  %v1152_v50 = vsel %vm1132_vm2, %v1077_v47, %v1151_v7  ;;  %v1109_v47 = vrot.slane %v4015_v40, %v3907_v19 }
 0x166   : > { %v908_v14 = vpop.xlane.xlu1 %907  ;;  %v926_v1 = vpop.xlane.xlu0 %925  ;;  %v1153_v56 = vsel %vm1134_vm3, %v1081_v55, %v1152_v50 }
 0x167   : > { %v4013_v6 = vmul.f32 0.17677669, %v908_v14  ;;  %v4027_v14 = vmul.f32 0.17677669, %v926_v1  ;;  %v1154_v1 = vsel %vm1136_vm4, %v1085_v16, %v1153_v56  ;;  %v1113_v51 = vrot.slane %v4022_v54, %v3907_v19 }
 0x168   : > { %v1155_v33 = vsel %vm1138_vm5, %v1089_v36, %v1154_v1  ;;  %v1159_v12 = vsel %vm1132_vm2, %v1109_v47, %v1158_v43 }
 0x169   : > { %v1093_v27 = vrot.slane %v4013_v6, %v3907_v19  ;;  %v1160_v1 = vsel %vm1134_vm3, %v1113_v51, %v1159_v12  ;;  %v4070_v51 = vsub.s32 1, %v3582_v3  ;;  %v4073_v12 = vsub.s32 2, %v3582_v3 }
 0x16a   : > { %v911_v24 = vpop.xlane.xlu1 %910  ;;  %v929_v13 = vpop.xlane.xlu0 %928 }
 0x16b   : > { %v4034_v32 = vmul.f32 0.17677669, %v911_v24  ;;  %v4038_v7 = vmul.f32 0.17677669, %v929_v13  ;;  %v1117_v24 = vrot.slane %v4027_v14, %v3907_v19  ;;  %v1156_v50 = vsel %vm1140_vm6, %v1093_v27, %v1155_v33 }
 0x16d   : > { %v1097_v22 = vrot.slane %v4034_v32, %v3907_v19  ;;  %v1121_v13 = vrot.slane %v4038_v7, %v3907_v19  ;;  %v1161_v33 = vsel %vm1136_vm4, %v1117_v24, %v1160_v1  ;;  %v4076_v24 = vsub.s32 5, %v3582_v3 }
 0x16e   : > { %v935_v55 = vpop.xlane.xlu1 %934  ;;  %v932_v16 = vpop.xlane.xlu0 %931 }
 0x16f   : > { %v4052_v56 = vmul.f32 0.17677669, %v935_v55  ;;  %v1157_v58 = vsel %vm1142_vm7, %v1097_v22, %v1156_v50  ;;  %v4056_v25 = vmul.f32 0.17677669, %v932_v16  ;;  %v1162_v48 = vsel %vm1138_vm5, %v1121_v13, %v1161_v33 }
 0x170   : > { %v1176_v36 = vsel %vm1169_vm8, %v1157_v58, -inf  ;;  %v3303_v58 = vmov 0  }
 0x171   : > { %v1129_v27 = vrot.slane %v4052_v56, %v3907_v19  ;;  %1177 = vmax.xlane.f32.xlu0 %v1176_v36  ;;  %v1125_v39 = vrot.slane %v4056_v25, %v3907_v19  ;;  %3003 = vset.pattern.permute.xlu1 %v3303_v58 }
 0x172   : > { %3002 = vset.pattern.permute.xlu0 %v3303_v58 }
 0x173   : > { %v1163_v22 = vsel %vm1140_vm6, %v1125_v39, %v1162_v48 }
 0x174   : > { %v1164_v43 = vsel %vm1142_vm7, %v1129_v27, %v1163_v22 }
 0x175   : > { %v1179_v47 = vsel %vm1169_vm8, %v1164_v43, -inf }
 0x176   : > { %1180 = vmax.xlane.f32.xlu1 %v1179_v47  ;;  %v4093_v47 = vsub.s32 3, %v3582_v3 }
 0x1e6   : > { %v4078_v55 = vpop.xlane.xlu0 %1171 }
 0x1e7   : > { %v1189_v50 = vrot.slane %v4078_v55, %v3590_v8  ;;  %v1193_v13 = vrot.slane %v4078_v55, %v4070_v51  ;;  %v1197_v16 = vrot.slane %v4078_v55, %v4073_v12  ;;  %v1209_v36 = vrot.slane %v4078_v55, %v4076_v24 }
 0x1e9   : > { %v1346_v1 = vsub.f32 %v3909_v30, %v1189_v50  ;;  %v1347_v27 = vsub.f32 %v3902_v29, %v1193_v13  ;;  %v1348_v33 = vsub.f32 %v3904_v61, %v1197_v16  ;;  %v1351_v39 = vsub.f32 %v3923_v46, %v1209_v36 }
 0x1ea   : > { %v1201_v46 = vrot.slane %v4078_v55, %v4093_v47  ;;  %v4106_v16 = vsub.s32 4, %v3582_v3  ;;  %v4109_v36 = vsub.s32 6, %v3582_v3 }
 0x1eb   : > { %v1378_v48 = vmul.f32 1.442695, %v1346_v1  ;;  %v1380_v22 = vmul.f32 1.442695, %v1347_v27  ;;  %v1382_v43 = vmul.f32 1.442695, %v1348_v33 }
 0x1ec   : > { %v1388_v58 = vmul.f32 1.442695, %v1351_v39  ;;  %v1349_v1 = vsub.f32 %v3911_v28, %v1201_v46  ;;  %v1205_v33 = vrot.slane %v4078_v55, %v4106_v16 }
 0x1ed   : > { %3008 = vpow2.f32 %v1378_v48 }
 0x1ee   : > { %3010 = vpow2.f32 %v1380_v22  ;;  %v4095_v37 = vpop.xlane.xlu1 %1174  ;;  %v1384_v22 = vmul.f32 1.442695, %v1349_v1 }
 0x1ef   : > { %v1221_v30 = vrot.slane %v4095_v37, %v3590_v8  ;;  %v1225_v29 = vrot.slane %v4095_v37, %v4070_v51  ;;  %3012 = vpow2.f32 %v1382_v43  ;;  %v1229_v27 = vrot.slane %v4095_v37, %v4073_v12 }
 0x1f0   : > { %3014 = vpow2.f32 %v1388_v58 }
 0x1f1   : > { %v1354_v61 = vsub.f32 %v3929_v62, %v1221_v30  ;;  %v1355_v50 = vsub.f32 %v3932_v5, %v1225_v29  ;;  %v1213_v5 = vrot.slane %v4078_v55, %v4109_v36  ;;  %v1356_v43 = vsub.f32 %v3935_v18, %v1229_v27 }
 0x1f2   : > { %v1350_v18 = vsub.f32 %v3917_v26, %v1205_v33 }
 0x1f3   : > { %v1394_v13 = vmul.f32 1.442695, %v1354_v61  ;;  %v1396_v62 = vmul.f32 1.442695, %v1355_v50  ;;  %v1352_v29 = vsub.f32 %v3927_v63, %v1213_v5  ;;  %v1233_v50 = vrot.slane %v4095_v37, %v4093_v47 }
 0x1f4   : > { %v1386_v33 = vmul.f32 1.442695, %v1350_v18  ;;  %v1237_v5 = vrot.slane %v4095_v37, %v4106_v16 }
 0x1f5   : > { %3016 = vpow2.f32 %v1394_v13  ;;  %v1398_v13 = vmul.f32 1.442695, %v1356_v43  ;;  %v1390_v63 = vmul.f32 1.442695, %v1352_v29 }
 0x1f6   : > { %3018 = vpow2.f32 %v1396_v62  ;;  %v1358_v29 = vsub.f32 %v3962_v59, %v1237_v5 }
 0x1f7   : > { %3020 = vpow2.f32 %v1384_v22  ;;  %v1357_v22 = vsub.f32 %v3940_v49, %v1233_v50 }
 0x1f8   : > { %v1402_v59 = vmul.f32 1.442695, %v1358_v29 }
 0x1fa   : > { %v4118_v39 = vpop.xlane.xlu0 %1177  ;;  %v4120_v48 = vpop.eup %3008 }
 0x1fb   : > { %v1253_v28 = vrot.slane %v4118_v39, %v3590_v8  ;;  %v4125_v58 = vpop.eup %3010  ;;  %1475 = vperm.xlu0 %3002, %v4120_v48   ;;  %v1261_v61 = vrot.slane %v4118_v39, %v4073_v12  ;;  %v1257_v18 = vrot.slane %v4118_v39, %v4070_v51 }
 0x1fc   : > { %1478 = vperm.xlu1 %3003, %v4125_v58   ;;  %v4133_v46 = vpop.eup %3012 }
 0x1fd   : > { %v1362_v30 = vsub.f32 %v3984_v15, %v1253_v28  ;;  %v4138_v1 = vpop.eup %3014  ;;  %v1364_v62 = vsub.f32 %v3986_v44, %v1261_v61  ;;  %v1245_v28 = vrot.slane %v4095_v37, %v4109_v36  ;;  %v1400_v61 = vmul.f32 1.442695, %v1357_v22 }
 0x1ff   : > { %v1410_v27 = vmul.f32 1.442695, %v1362_v30  ;;  %v4140_v15 = vpop.xlane.xlu1 %1180  ;;  %1490 = vperm.xlu0 %3002, %v4138_v1   ;;  %v1414_v44 = vmul.f32 1.442695, %v1364_v62  ;;  %v1360_v50 = vsub.f32 %v3964_v34, %v1245_v28 }
 0x200   : > { %1481 = vperm.xlu1 %3003, %v4133_v46   ;;  %v1289_v26 = vrot.slane %v4140_v15, %v4070_v51 }
 0x201   : > { %3022 = vpow2.f32 %v1410_v27  ;;  %v1406_v34 = vmul.f32 1.442695, %v1360_v50 }
 0x202   : > { %3024 = vpow2.f32 %v1398_v13  ;;  %v4150_v43 = vpop.eup %3016  ;;  %v1371_v30 = vsub.f32 %v4009_v9, %v1289_v26  ;;  %v1293_v13 = vrot.slane %v4140_v15, %v4073_v12  ;;  %v1241_v9 = vrot.slane %v4095_v37, %v4076_v24 }
 0x203   : > { %3026 = vpow2.f32 %v1390_v63  ;;  %v4159_v49 = vpop.eup %3018  ;;  %v1363_v63 = vsub.f32 %v3980_v11, %v1257_v18  ;;  %v4171_v26 = vsub.s32 7, %v3582_v3 }
 0x204   : > { %1499 = vperm.xlu1 %3003, %v4150_v43   ;;  %3028 = vpow2.f32 %v1386_v33  ;;  %v1428_v27 = vmul.f32 1.442695, %v1371_v30  ;;  %v4168_v62 = vpop.eup %3020  ;;  %v1269_v33 = vrot.slane %v4118_v39, %v4106_v16  ;;  %v1372_v5 = vsub.f32 %v4015_v40, %v1293_v13 }
 0x205   : > { %3030 = vpow2.f32 %v1414_v44  ;;  %v1359_v28 = vsub.f32 %v3957_v4, %v1241_v9  ;;  %v1412_v11 = vmul.f32 1.442695, %v1363_v63  ;;  %v1285_v44 = vrot.slane %v4140_v15, %v3590_v8 }
 0x206   : > { %3032 = vpow2.f32 %v1400_v61  ;;  %v1273_v40 = vrot.slane %v4118_v39, %v4076_v24  ;;  %v1366_v30 = vsub.f32 %v3994_v21, %v1269_v33  ;;  %v1430_v29 = vmul.f32 1.442695, %v1372_v5 }
 0x207   : > { %3034 = vpow2.f32 %v1428_v27  ;;  %v1217_v4 = vrot.slane %v4078_v55, %v4171_v26  ;;  %v1404_v18 = vmul.f32 1.442695, %v1359_v28  ;;  %v1370_v50 = vsub.f32 %v4006_v2, %v1285_v44 }
 0x208   : > { %1502 = vperm.xlu1 %3003, %v4159_v49   ;;  %3036 = vpow2.f32 %v1402_v59  ;;  %v1277_v27 = vrot.slane %v4118_v39, %v4109_v36  ;;  %v1367_v21 = vsub.f32 %v3999_v35, %v1273_v40  ;;  %v1418_v9 = vmul.f32 1.442695, %v1366_v30 }
 0x209   : > { %3038 = vpow2.f32 %v1406_v34  ;;  %v1353_v55 = vsub.f32 %v3950_v41, %v1217_v4  ;;  %v1265_v2 = vrot.slane %v4118_v39, %v4093_v47  ;;  %v1426_v63 = vmul.f32 1.442695, %v1370_v50 }
 0x20a   : > { %3040 = vpow2.f32 %v1412_v11  ;;  %v1281_v35 = vrot.slane %v4118_v39, %v4171_v26  ;;  %v1368_v33 = vsub.f32 %v4013_v6, %v1277_v27  ;;  %v1420_v5 = vmul.f32 1.442695, %v1367_v21 }
 0x20b   : > { %3042 = vpow2.f32 %v1430_v29  ;;  %v1392_v41 = vmul.f32 1.442695, %v1353_v55  ;;  %v1249_v11 = vrot.slane %v4095_v37, %v4171_v26  ;;  %v1365_v44 = vsub.f32 %v3991_v45, %v1265_v2 }
 0x20c   : > { %1484 = vperm.xlu1 %3003, %v4168_v62   ;;  %3044 = vpow2.f32 %v1404_v18  ;;  %v1369_v39 = vsub.f32 %v4034_v32, %v1281_v35  ;;  %v1422_v6 = vmul.f32 1.442695, %v1368_v33  ;;  %v1313_v30 = vrot.slane %v4140_v15, %v4171_v26 }
 0x20d   : > { %3046 = vpow2.f32 %v1418_v9  ;;  %v1361_v37 = vsub.f32 %v3978_v0, %v1249_v11  ;;  %v1416_v45 = vmul.f32 1.442695, %v1365_v44  ;;  %v1297_v4 = vrot.slane %v4140_v15, %v4093_v47 }
 0x20e   : > { %v4177_v22 = vpop.eup %3022  ;;  %3048 = vpow2.f32 %v1426_v63  ;;  %v1424_v32 = vmul.f32 1.442695, %v1369_v39  ;;  %v1377_v50 = vsub.f32 %v4052_v56, %v1313_v30  ;;  %v1301_v0 = vrot.slane %v4140_v15, %v4106_v16 }
 0x20f   : > { %v4182_v3 = vpop.eup %3024  ;;  %1523 = vperm.xlu0 %3002, %v4177_v22   ;;  %3050 = vpow2.f32 %v1420_v5  ;;  %v1408_v21 = vmul.f32 1.442695, %v1361_v37  ;;  %v1373_v9 = vsub.f32 %v4022_v54, %v1297_v4  ;;  %v1305_v56 = vrot.slane %v4140_v15, %v4076_v24 }
 0x210   : > { %1505 = vperm.xlu1 %3003, %v4182_v3   ;;  %v4189_v61 = vpop.eup %3026  ;;  %3052 = vpow2.f32 %v1392_v41  ;;  %v1440_v2 = vmul.f32 1.442695, %v1377_v50  ;;  %v1374_v35 = vsub.f32 %v4027_v14, %v1301_v0  ;;  %v1309_v41 = vrot.slane %v4140_v15, %v4109_v36 }
 0x211   : > { %v4194_v13 = vpop.eup %3028  ;;  %3054 = vpow2.f32 %v1422_v6  ;;  %v1432_v33 = vmul.f32 1.442695, %v1373_v9  ;;  %v1375_v11 = vsub.f32 %v4038_v7, %v1305_v56 }
 0x212   : > { %v4201_v59 = vpop.eup %3030  ;;  %3056 = vpow2.f32 %v1416_v45  ;;  %v1434_v44 = vmul.f32 1.442695, %v1374_v35  ;;  %v1376_v6 = vsub.f32 %v4056_v25, %v1309_v41 }
 0x213   : > { %1493 = vperm.xlu0 %3002, %v4189_v61   ;;  %v4206_v34 = vpop.eup %3032  ;;  %3058 = vpow2.f32 %v1424_v32  ;;  %v1436_v30 = vmul.f32 1.442695, %v1375_v11 }
 0x214   : > { %1487 = vperm.xlu1 %3003, %v4194_v13   ;;  %v4213_v28 = vpop.eup %3034  ;;  %3060 = vpow2.f32 %v1408_v21  ;;  %v1438_v15 = vmul.f32 1.442695, %v1376_v6 }
 0x215   : > { %v4218_v40 = vpop.eup %3036  ;;  %3062 = vpow2.f32 %v1440_v2 }
 0x216   : > { %v4225_v29 = vpop.eup %3038  ;;  %3064 = vpow2.f32 %v1432_v33 }
 0x217   : > { %1529 = vperm.xlu0 %3002, %v4201_v59   ;;  %v4230_v18 = vpop.eup %3040  ;;  %3066 = vpow2.f32 %v1434_v44 }
 0x218   : > { %1508 = vperm.xlu1 %3003, %v4206_v34   ;;  %v4235_v27 = vpop.eup %3042  ;;  %3068 = vpow2.f32 %v1436_v30 }
 0x219   : > { %v4240_v55 = vpop.eup %3044  ;;  %3070 = vpow2.f32 %v1438_v15 }
 0x21a   : > { %v4244_v63 = vpop.eup %3046 }
 0x21b   : > { %1550 = vperm.xlu0 %3002, %v4213_v28   ;;  %4821 = vst [vmem:[#allocation53_spill] sm:$0xff] %v4244_v63  ;;  %v4249_v5 = vpop.eup %3048 }
 0x21c   : > { %1511 = vperm.xlu1 %3003, %v4218_v40   ;;  %v4253_v54 = vpop.eup %3050 }
 0x21d   : > { %4822 = vst [vmem:[#allocation54_spill] sm:$0xff] %v4253_v54  ;;  %v4258_v39 = vpop.eup %3052 }
 0x21e   : > { %v4262_v14 = vpop.eup %3054 }
 0x21f   : > { %1517 = vperm.xlu0 %3002, %v4225_v29   ;;  %4823 = vst [vmem:[#allocation55_spill] sm:$0xff] %v4262_v14  ;;  %v4265_v37 = vpop.eup %3056 }
 0x220   : > { %1526 = vperm.xlu1 %3003, %v4230_v18   ;;  %v4269_v7 = vpop.eup %3058 }
 0x221   : > { %4824 = vst [vmem:[#allocation56_spill] sm:$0xff] %v4269_v7  ;;  %v4271_v45 = vpop.eup %3060 }
 0x222   : > { %v4275_v4 = vpop.eup %3062 }
 0x223   : > { %1553 = vperm.xlu0 %3002, %v4235_v27   ;;  %4825 = vst [vmem:[#allocation57_spill] sm:$0xff] %v4275_v4  ;;  %v4277_v25 = vpop.eup %3064 }
 0x224   : > { %1514 = vperm.xlu1 %3003, %v4240_v55   ;;  %v4281_v32 = vpop.eup %3066 }
 0x225   : > { %4826 = vst [vmem:[#allocation58_spill] sm:$0xff] %v4281_v32  ;;  %v4284_v50 = vpop.eup %3068 }
 0x226   : > { %4827 = vst [vmem:[#allocation59_spill] sm:$0xff] %v4284_v50  ;;  %v4287_v21 = vpop.eup %3070 }
 0x227   : > { %1535 = vperm.xlu0 %3002, %v4244_v63   ;;  %4828 = vst [vmem:[#allocation60_spill] sm:$0xff] %v4287_v21 }
 0x228   : > { %1547 = vperm.xlu1 %3003, %v4249_v5  }
 0x22b   : > { %1538 = vperm.xlu0 %3002, %v4253_v54  }
 0x22c   : > { %1496 = vperm.xlu1 %3003, %v4258_v39  }
 0x22f   : > { %1541 = vperm.xlu0 %3002, %v4262_v14  }
 0x230   : > { %1532 = vperm.xlu1 %3003, %v4265_v37  }
 0x233   : > { %1544 = vperm.xlu0 %3002, %v4269_v7  }
 0x234   : > { %1520 = vperm.xlu1 %3003, %v4271_v45  }
 0x237   : > { %1568 = vperm.xlu0 %3002, %v4275_v4  }
 0x238   : > { %1556 = vperm.xlu1 %3003, %v4277_v25  }
 0x23c   : > { %1559 = vperm.xlu1 %3003, %v4281_v32  }
 0x240   : > { %1562 = vperm.xlu1 %3003, %v4284_v50  }
 0x244   : > { %1565 = vperm.xlu1 %3003, %v4287_v21  }
 0x276   : > { %v1476_v56 = vpop.permute.xlu0 %1475 }
 0x277   : > { %v1479_v0 = vpop.permute.xlu1 %1478  ;;  %v1573_v10 = vrot.slane %v1476_v56, %v3907_v19 }
 0x278   : > { %v1577_v23 = vrot.slane %v1479_v0, %v3907_v19 }
 0x27a   : > { %v1491_v33 = vpop.permute.xlu0 %1490  ;;  %v1698_v7 = vsel %vm1130_vm1, %v1577_v23, %v1573_v10 }
 0x27b   : > { %v1482_v9 = vpop.permute.xlu1 %1481  ;;  %v1593_v56 = vrot.slane %v1491_v33, %v3907_v19 }
 0x27c   : > { %v1581_v31 = vrot.slane %v1482_v9, %v3907_v19 }
 0x27e   : > { %v1699_v21 = vsel %vm1132_vm2, %v1581_v31, %v1698_v7 }
 0x27f   : > { %v1500_v2 = vpop.permute.xlu1 %1499 }
 0x283   : > { %v1503_v35 = vpop.permute.xlu1 %1502 }
 0x284   : > { %v1609_v9 = vrot.slane %v1503_v35, %v3907_v19 }
 0x287   : > { %v1485_v41 = vpop.permute.xlu1 %1484 }
 0x288   : > { %v1585_v42 = vrot.slane %v1485_v41, %v3907_v19 }
 0x28a   : > { %v1524_v11 = vpop.permute.xlu0 %1523  ;;  %v1700_v14 = vsel %vm1134_vm3, %v1585_v42, %v1699_v21  ;;  %v1605_v42 = vrot.slane %v1500_v2, %v3907_v19 }
 0x28b   : > { %v1506_v44 = vpop.permute.xlu1 %1505  ;;  %v1637_v23 = vrot.slane %v1524_v11, %v3907_v19 }
 0x28c   : > { %v1613_v63 = vrot.slane %v1506_v44, %v3907_v19  ;;  %v1705_v21 = vsel %vm1130_vm1, %v1609_v9, %v1605_v42 }
 0x28e   : > { %v1494_v6 = vpop.permute.xlu0 %1493  ;;  %v1706_v2 = vsel %vm1132_vm2, %v1613_v63, %v1705_v21 }
 0x28f   : > { %v1488_v30 = vpop.permute.xlu1 %1487  ;;  %v1597_v10 = vrot.slane %v1494_v6, %v3907_v19 }
 0x290   : > { %v1589_v60 = vrot.slane %v1488_v30, %v3907_v19 }
 0x292   : > { %v1530_v15 = vpop.permute.xlu0 %1529  ;;  %v1701_v0 = vsel %vm1136_vm4, %v1589_v60, %v1700_v14 }
 0x293   : > { %v1509_v17 = vpop.permute.xlu1 %1508  ;;  %v1702_v30 = vsel %vm1138_vm5, %v1593_v56, %v1701_v0  ;;  %v1645_v11 = vrot.slane %v1530_v15, %v3907_v19 }
 0x294   : > { %v1617_v60 = vrot.slane %v1509_v17, %v3907_v19 }
 0x296   : > { %v4290_v20 = vpop.permute.xlu0 %1550 }
 0x297   : > { %v1512_v57 = vpop.permute.xlu1 %1511 }
 0x298   : > { %v1621_v7 = vrot.slane %v1512_v57, %v3907_v19  ;;  %v1707_v57 = vsel %vm1134_vm3, %v1617_v60, %v1706_v2 }
 0x29a   : > { %v1518_v53 = vpop.permute.xlu0 %1517  ;;  %v1708_v9 = vsel %vm1136_vm4, %v1621_v7, %v1707_v57 }
 0x29b   : > { %v1527_v38 = vpop.permute.xlu1 %1526 }
 0x29c   : > { %v1641_v41 = vrot.slane %v1527_v38, %v3907_v19  ;;  %v1703_v38 = vsel %vm1140_vm6, %v1597_v10, %v1702_v30 }
 0x29e   : > { %v4296_v52 = vpop.permute.xlu0 %1553  ;;  %v1712_v35 = vsel %vm1130_vm1, %v1641_v41, %v1637_v23 }
 0x29f   : > { %v1515_v4 = vpop.permute.xlu1 %1514 }
 0x2a0   : > { %v1625_v33 = vrot.slane %v1515_v4, %v3907_v19  ;;  %v1713_v4 = vsel %vm1132_vm2, %v1645_v11, %v1712_v35  ;;  %v1673_v11 = vrot.slane %v4290_v20, %v3907_v19 }
 0x2a2   : > { %v1536_v50 = vpop.permute.xlu0 %1535  ;;  %v1709_v30 = vsel %vm1138_vm5, %v1625_v33, %v1708_v9 }
 0x2a3   : > { %v1548_v54 = vpop.permute.xlu1 %1547  ;;  %v1653_v41 = vrot.slane %v1536_v50, %v3907_v19 }
 0x2a6   : > { %v1539_v32 = vpop.permute.xlu0 %1538 }
 0x2a7   : > { %v1497_v31 = vpop.permute.xlu1 %1496  ;;  %v1657_v63 = vrot.slane %v1539_v32, %v3907_v19 }
 0x2a8   : > { %v1601_v14 = vrot.slane %v1497_v31, %v3907_v19  ;;  %v1629_v31 = vrot.slane %v1518_v53, %v3907_v19 }
 0x2aa   : > { %v1542_v44 = vpop.permute.xlu0 %1541  ;;  %v1704_v6 = vsel %vm1142_vm7, %v1601_v14, %v1703_v38  ;;  %v1710_v38 = vsel %vm1140_vm6, %v1629_v31, %v1709_v30 }
 0x2ab   : > { %v1533_v17 = vpop.permute.xlu1 %1532  ;;  %v1730_v0 = vsel %vm1169_vm8, %v1704_v6, 0.0  ;;  %v1661_v23 = vrot.slane %v1542_v44, %v3907_v19  ;;  %v1669_v44 = vrot.slane %v1548_v54, %v3907_v19 }
 0x2ac   : > { %v1649_v56 = vrot.slane %v1533_v17, %v3907_v19  ;;  %1731 = vadd.xlane.f32.xlu1 %v1730_v0 }
 0x2ad   : > { %v1719_v17 = vsel %vm1130_vm1, %v1673_v11, %v1669_v44 }
 0x2ae   : > { %v1714_v15 = vsel %vm1134_vm3, %v1649_v56, %v1713_v4  ;;  %v1545_v10 = vpop.permute.xlu0 %1544  ;;  %v1677_v56 = vrot.slane %v4296_v52, %v3907_v19 }
 0x2af   : > { %v1715_v42 = vsel %vm1136_vm4, %v1653_v41, %v1714_v15  ;;  %v1521_v60 = vpop.permute.xlu1 %1520  ;;  %v1665_v50 = vrot.slane %v1545_v10, %v3907_v19 }
 0x2b0   : > { %v1633_v14 = vrot.slane %v1521_v60, %v3907_v19  ;;  %v1716_v7 = vsel %vm1138_vm5, %v1657_v63, %v1715_v42  ;;  %v1720_v54 = vsel %vm1132_vm2, %v1677_v56, %v1719_v17 }
 0x2b1   : > { %v1717_v32 = vsel %vm1140_vm6, %v1661_v23, %v1716_v7 }
 0x2b2   : > { %v1711_v21 = vsel %vm1142_vm7, %v1633_v14, %v1710_v38  ;;  %v1718_v33 = vsel %vm1142_vm7, %v1665_v50, %v1717_v32  ;;  %v1569_v4 = vpop.permute.xlu0 %1568 }
 0x2b3   : > { %v1557_v35 = vpop.permute.xlu1 %1556  ;;  %v1733_v53 = vsel %vm1169_vm8, %v1711_v21, 0.0  ;;  %v1736_v2 = vsel %vm1169_vm8, %v1718_v33, 0.0  ;;  %v1697_v10 = vrot.slane %v1569_v4, %v3907_v19 }
 0x2b4   : > { %1734 = vadd.xlane.f32.xlu0 %v1733_v53  ;;  %v1681_v0 = vrot.slane %v1557_v35, %v3907_v19 }
 0x2b6   : > { %v1721_v30 = vsel %vm1134_vm3, %v1681_v0, %v1720_v54 }
 0x2b7   : > { %v1560_v6 = vpop.permute.xlu1 %1559 }
 0x2b8   : > { %1737 = vadd.xlane.f32.xlu0 %v1736_v2  ;;  %v1685_v9 = vrot.slane %v1560_v6, %v3907_v19 }
 0x2ba   : > { %v1722_v20 = vsel %vm1136_vm4, %v1685_v9, %v1721_v30 }
 0x2bb   : > { %v1563_v57 = vpop.permute.xlu1 %1562 }
 0x2bc   : > { %v1689_v41 = vrot.slane %v1563_v57, %v3907_v19 }
 0x2be   : > { %v1723_v31 = vsel %vm1138_vm5, %v1689_v41, %v1722_v20 }
 0x2bf   : > { %v1566_v63 = vpop.permute.xlu1 %1565 }
 0x2c0   : > { %v1693_v15 = vrot.slane %v1566_v63, %v3907_v19 }
 0x2c2   : > { %v1724_v52 = vsel %vm1140_vm6, %v1693_v15, %v1723_v31 }
 0x2c3   : > { %v1725_v42 = vsel %vm1142_vm7, %v1697_v10, %v1724_v52 }
 0x2c4   : > { %v1739_v23 = vsel %vm1169_vm8, %v1725_v42, 0.0 }
 0x2c5   : > { %1740 = vadd.xlane.f32.xlu1 %v1739_v23 }
 0x335   : > { %v1732_v60 = vpop.xlane.xlu1 %1731 }
 0x336   : > { %3072 = vrcp.f32 %v1732_v60 }
 0x33d   : > { %v1735_v14 = vpop.xlane.xlu0 %1734 }
 0x33e   : > { %3074 = vrcp.f32 %v1735_v14  ;;  %v379_v14 = vld [vmem:[%s3572_s1] sm:$0xff] }
 0x341   : > { %v1738_v53 = vpop.xlane.xlu0 %1737 }
 0x342   : > { %3076 = vrcp.f32 %v1738_v53  ;;  %v4831_v53 = vld [vmem:[#allocation54_spill] sm:$0xff] }
 0x343   : > { %v3073_v50 = vpop.eup %3072 }
 0x344   : > { %v1753_v7 = vrot.slane %v3073_v50, %v3590_v8  ;;  %v1757_v38 = vrot.slane %v3073_v50, %v4070_v51  ;;  %v1761_v35 = vrot.slane %v3073_v50, %v4073_v12  ;;  %v1765_v17 = vrot.slane %v3073_v50, %v4093_v47 }
 0x345   : > { %v1773_v54 = vrot.slane %v3073_v50, %v4076_v24  ;;  %v1777_v15 = vrot.slane %v3073_v50, %v4109_v36 }
 0x346   : > { %v1910_v32 = vmul.f32 %v4120_v48, %v1753_v7  ;;  %v1911_v21 = vmul.f32 %v4125_v58, %v1757_v38  ;;  %v1912_v33 = vmul.f32 %v4133_v46, %v1761_v35  ;;  %v1769_v46 = vrot.slane %v3073_v50, %v4106_v16 }
 0x347   : > { %v1913_v56 = vmul.f32 %v4168_v62, %v1765_v17  ;;  %v1916_v10 = vmul.f32 %v4189_v61, %v1777_v15  ;;  %v4834_v17 = vld [vmem:[#allocation60_spill] sm:$0xff]  ;;  %v4851_v15 = vld [vmem:[#allocation45_spill] sm:$0xff] }
 0x348   : > { %1951 = vperm.xlu0 %3002, %v1910_v32   ;;  %1954 = vperm.xlu1 %3003, %v1911_v21   ;;  %v1914_v9 = vmul.f32 %v4194_v13, %v1769_v46  ;;  %v4829_v32 = vld [vmem:[#allocation53_spill] sm:$0xff] }
 0x34b   : > { %v4366_v44 = vpop.eup %3074 }
 0x34c   : > { %1957 = vperm.xlu1 %3003, %v1912_v33   ;;  %v1789_v6 = vrot.slane %v4366_v44, %v4070_v51  ;;  %v1785_v2 = vrot.slane %v4366_v44, %v3590_v8  ;;  %v1793_v11 = vrot.slane %v4366_v44, %v4073_v12  ;;  %v1801_v41 = vrot.slane %v4366_v44, %v4106_v16 }
 0x34d   : > { %v1805_v20 = vrot.slane %v4366_v44, %v4076_v24 }
 0x34e   : > { %v1919_v48 = vmul.f32 %v4159_v49, %v1789_v6  ;;  %v1918_v58 = vmul.f32 %v4150_v43, %v1785_v2  ;;  %v1741_v0 = vpop.xlane.xlu1 %1740  ;;  %v1920_v57 = vmul.f32 %v4182_v3, %v1793_v11  ;;  %v1797_v49 = vrot.slane %v4366_v44, %v4093_v47  ;;  %v4832_v6 = vld [vmem:[#allocation59_spill] sm:$0xff] }
 0x34f   : > { %3078 = vrcp.f32 %v1741_v0  ;;  %v4387_v4 = vpop.eup %3076  ;;  %v1922_v62 = vmul.f32 %v4218_v40, %v1801_v41  ;;  %v1915_v3 = vmul.f32 %v4138_v1, %v1773_v54  ;;  %v1923_v1 = vmul.f32 %v4240_v55, %v1805_v20  ;;  %v4840_v41 = vld [vmem:[#allocation36_spill] sm:$0xff]  ;;  %v4850_v20 = vld [vmem:[#allocation47_spill] sm:$0xff] }
 0x350   : > { %2097 = vperm.xlu1 %3003, %v1919_v48   ;;  %2094 = vperm.xlu0 %3002, %v1918_v58   ;;  %v1921_v43 = vmul.f32 %v4206_v34, %v1797_v49  ;;  %v1821_v30 = vrot.slane %v4387_v4, %v4070_v51  ;;  %v1817_v34 = vrot.slane %v4387_v4, %v3590_v8  ;;  %v4842_v54 = vld [vmem:[#allocation44_spill] sm:$0xff] }
 0x351   : > { %v1829_v60 = vrot.slane %v4387_v4, %v4093_v47  ;;  %v1845_v11 = vrot.slane %v4387_v4, %v4171_v26 }
 0x352   : > { %v1927_v13 = vmul.f32 %v4230_v18, %v1821_v30  ;;  %v1926_v63 = vmul.f32 %v4177_v22, %v1817_v34  ;;  %v1825_v22 = vrot.slane %v4387_v4, %v4073_v12  ;;  %v1781_v18 = vrot.slane %v3073_v50, %v4171_v26  ;;  %v4846_v30 = vld [vmem:[#allocation35_spill] sm:$0xff]  ;;  %v4847_v34 = vld [vmem:[#allocation34_spill] sm:$0xff] }
 0x353   : > { %v3304_v50 = vmov 0.0  }
 0x354   : > { %2100 = vperm.xlu1 %3003, %v1920_v57   ;;  %1960 = vperm.xlu0 %3002, %v1913_v56   ;;  %v1928_v42 = vmul.f32 %v4201_v59, %v1825_v22  ;;  %v1917_v61 = vmul.f32 %v4258_v39, %v1781_v18  ;;  %v1929_v59 = vmul.f32 %v4265_v37, %v1829_v60  ;;  %v380_v37 = vld [vmem:[%s3572_s1 + $0x8] sm:$0xff]  ;;  %v4836_v56 = vld [vmem:[#allocation57_spill] sm:$0xff]  ;;  %v4856_v22 = vld [vmem:[#allocation50_spill] sm:$0xff] }
 0x355   : > { %2907 = vmatprep.subr.mxu0 %v3304_v50  ;;  %2909 = vmatprep.mubr.msk.f32.mxu0 %vm3305_vm9, %v3304_v50  ;;  %v4857_v18 = vld [vmem:[#allocation41_spill] sm:$0xff] }
 0x356   : > { %2908 = vmatpush3.msra.mxu0 %v379_v14  ;;  %2912 = vmatprep.subr.mxu1 %v3304_v50 }
 0x357   : > { %2914 = vmatprep.mubr.msk.f32.mxu1 %vm3305_vm9, %v3304_v50  ;;  %2917 = vmatprep.subr.mxu0 %v3304_v50 }
 0x358   : > { %2103 = vperm.xlu1 %3003, %v1921_v43   ;;  %1963 = vperm.xlu0 %3002, %v1914_v9   ;;  %v4838_v43 = vld [vmem:[#allocation32_spill] sm:$0xff]  ;;  %v4839_v9 = vld [vmem:[#allocation21_spill] sm:$0xff] }
 0x359   : > { %2913 = vmatpush3.msra.mxu1 %v380_v37 }
 0x35a   : > { %2922 = vmatprep.subr.mxu1 %v3304_v50 }
 0x35c   : > { %2106 = vperm.xlu1 %3003, %v1922_v62   ;;  %1966 = vperm.xlu0 %3002, %v1915_v3   ;;  %v4400_v40 = vpop.eup %3078  ;;  %v4844_v62 = vld [vmem:[#allocation23_spill] sm:$0xff] }
 0x35d   : > { %v1849_v31 = vrot.slane %v4400_v40, %v3590_v8  ;;  %v1853_v55 = vrot.slane %v4400_v40, %v4070_v51  ;;  %v1809_v8 = vrot.slane %v4366_v44, %v4109_v36  ;;  %v1813_v51 = vrot.slane %v4366_v44, %v4171_v26  ;;  %v4845_v3 = vld [vmem:[#allocation39_spill] sm:$0xff] }
 0x35e   : > { %v1861_v38 = vrot.slane %v4400_v40, %v4093_v47  ;;  %v4830_v47 = vld [vmem:[#allocation58_spill] sm:$0xff]  ;;  %v1869_v44 = vrot.slane %v4400_v40, %v4076_v24  ;;  %v1873_v58 = vrot.slane %v4400_v40, %v4109_v36  ;;  %v1877_v57 = vrot.slane %v4400_v40, %v4171_v26  ;;  %v4841_v26 = vld [vmem:[#allocation27_spill] sm:$0xff] }
 0x35f   : > { %v1934_v52 = vmul.f32 %v4249_v5, %v1849_v31  ;;  %v1935_v23 = vmul.f32 %v4213_v28, %v1853_v55  ;;  %v1924_v28 = vmul.f32 %v4225_v29, %v1809_v8  ;;  %v1857_v5 = vrot.slane %v4400_v40, %v4073_v12  ;;  %v4855_v31 = vld [vmem:[#allocation38_spill] sm:$0xff] }
 0x360   : > { %2240 = vperm.xlu1 %3003, %v1927_v13   ;;  %2237 = vperm.xlu0 %3002, %v1926_v63   ;;  %v1925_v39 = vmul.f32 %v4271_v45, %v1813_v51  ;;  %v1833_v29 = vrot.slane %v4387_v4, %v4106_v16  ;;  %v1937_v12 = vmul.f32 %v4277_v25, %v1861_v38  ;;  %v4848_v13 = vld [vmem:[#allocation43_spill] sm:$0xff]  ;;  %v4849_v63 = vld [vmem:[#allocation42_spill] sm:$0xff] }
 0x361   : > { %v1936_v7 = vmul.f32 %v4235_v27, %v1857_v5  ;;  %v1865_v45 = vrot.slane %v4400_v40, %v4106_v16  ;;  %v1837_v27 = vrot.slane %v4387_v4, %v4076_v24  ;;  %v1841_v25 = vrot.slane %v4387_v4, %v4109_v36  ;;  %v4833_v16 = vld [vmem:[#allocation55_spill] sm:$0xff]  ;;  %v4835_v24 = vld [vmem:[#allocation56_spill] sm:$0xff]  ;;  %v4837_v36 = vld [vmem:[#allocation26_spill] sm:$0xff] }
 0x362   : > { %v1930_v21 = vmul.f32 %v4829_v32, %v1833_v29  ;;  %v1939_v2 = vmul.f32 %v4832_v6, %v1869_v44  ;;  %v1940_v0 = vmul.f32 %v4834_v17, %v1873_v58  ;;  %v1933_v46 = vmul.f32 %v4835_v24, %v1845_v11  ;;  %v4843_v4 = vld [vmem:[#allocation30_spill] sm:$0xff]  ;;  %v4852_v40 = vld [vmem:[#allocation37_spill] sm:$0xff] }
 0x363   : > { %v1938_v35 = vmul.f32 %v4830_v47, %v1865_v45  ;;  %v1931_v33 = vmul.f32 %v4831_v53, %v1837_v27  ;;  %v1932_v48 = vmul.f32 %v4833_v16, %v1841_v25  ;;  %v1941_v49 = vmul.f32 %v4836_v56, %v1877_v57 }
 0x364   : > { %2109 = vperm.xlu1 %3003, %v1923_v1   ;;  %1969 = vperm.xlu0 %3002, %v1916_v10   ;;  %v4853_v1 = vld [vmem:[#allocation49_spill] sm:$0xff]  ;;  %v4854_v10 = vld [vmem:[#allocation46_spill] sm:$0xff] }
 0x368   : > { %2380 = vperm.xlu1 %3003, %v1934_v52   ;;  %2243 = vperm.xlu0 %3002, %v1928_v42   ;;  %v4858_v52 = vld [vmem:[#allocation48_spill] sm:$0xff] }
 0x36c   : > { %1972 = vperm.xlu1 %3003, %v1917_v61   ;;  %2383 = vperm.xlu0 %3002, %v1935_v23  }
 0x370   : > { %2246 = vperm.xlu1 %3003, %v1929_v59   ;;  %2112 = vperm.xlu0 %3002, %v1924_v28  }
 0x374   : > { %2115 = vperm.xlu1 %3003, %v1925_v39   ;;  %2386 = vperm.xlu0 %3002, %v1936_v7  }
 0x378   : > { %2389 = vperm.xlu1 %3003, %v1937_v12   ;;  %2249 = vperm.xlu0 %3002, %v1930_v21  }
 0x37c   : > { %2392 = vperm.xlu1 %3003, %v1938_v35   ;;  %2252 = vperm.xlu0 %3002, %v1931_v33  }
 0x380   : > { %2395 = vperm.xlu1 %3003, %v1939_v2   ;;  %2255 = vperm.xlu0 %3002, %v1932_v48  }
 0x384   : > { %2398 = vperm.xlu1 %3003, %v1940_v0   ;;  %2258 = vperm.xlu0 %3002, %v1933_v46   ;;  %v381_v46 = vld [vmem:[%s3572_s1 + $0x10] sm:$0xff] }
 0x388   : > { %2401 = vperm.xlu0 %3002, %v1941_v49   ;;  %2545 = vrot.lane.b32.xlu1 %v4837_v36, %s3306_s28 }
 0x38c   : > { %2569 = vrot.lane.b32.xlu1 %v4838_v43, %s3306_s28  ;;  %2533 = vrot.lane.b32.xlu0 %v4839_v9, %s3306_s28 }
 0x390   : > { %2605 = vrot.lane.b32.xlu1 %v4840_v41, %s3306_s28  ;;  %2557 = vrot.lane.b32.xlu0 %v4841_v26, %s3306_s28 }
 0x394   : > { %2629 = vrot.lane.b32.xlu1 %v4842_v54, %s3306_s28  ;;  %2593 = vrot.lane.b32.xlu0 %v4843_v4, %s3306_s28 }
 0x398   : > { %2537 = vrot.lane.b32.xlu1 %v4844_v62, %s3307_s16  ;;  %2617 = vrot.lane.b32.xlu0 %v4845_v3, %s3306_s28 }
 0x39c   : > { %2561 = vrot.lane.b32.xlu1 %v4846_v30, %s3307_s16  ;;  %2549 = vrot.lane.b32.xlu0 %v4847_v34, %s3307_s16 }
 0x3a0   : > { %2597 = vrot.lane.b32.xlu1 %v4848_v13, %s3307_s16  ;;  %2573 = vrot.lane.b32.xlu0 %v4849_v63, %s3307_s16 }
 0x3a4   : > { %2621 = vrot.lane.b32.xlu1 %v4850_v20, %s3307_s16  ;;  %2609 = vrot.lane.b32.xlu0 %v4851_v15, %s3307_s16  ;;  %v382_v20 = vld [vmem:[%s3572_s1 + $0x18] sm:$0xff]  ;;  %s3196_s1 = sshll.u32 %s3309_s11, 4  ;;  %s3197_s1 = int_to_ptr.vmem [resolvable:$false] %s3196_s1 }
 0x3a5   : > { %s3198_s26 = scalar_lea.vmem %s3197_s1, 256  ;;  %p3199_p9 = scmp.lt.s32.totalorder %s4641_s24, %s3197_s1 }
 0x3a6   : > { %p3200_p6 = scmp.lt.s32.totalorder %s3198_s26, %s3192_s17 }
 0x3a8   : > { %2553 = vrot.lane.b32.xlu1 %v4852_v40, %s3308_s12  ;;  %2633 = vrot.lane.b32.xlu0 %v4853_v1, %s3307_s16  ;;  %p3201_p12 = por %p3200_p6, %p3199_p9 }
 0x3aa   : > { %p3202_p0 = pnand %p3201_p12, %p3195_p3 }
 0x3ac   : > { %2577 = vrot.lane.b32.xlu1 %v4854_v10, %s3308_s12  ;;  %2541 = vrot.lane.b32.xlu0 %v4855_v31, %s3308_s12 }
 0x3b0   : > { %2613 = vrot.lane.b32.xlu1 %v4856_v22, %s3308_s12  ;;  %2565 = vrot.lane.b32.xlu0 %v4857_v18, %s3308_s12 }
 0x3b4   : > { %2601 = vrot.lane.b32.xlu0 %v4858_v52, %s3308_s12 }
 0x3c3   : > { %v1955_v42 = vpop.permute.xlu1 %1954  ;;  %v1952_v55 = vpop.permute.xlu0 %1951 }
 0x3c4   : > { %v1981_v37 = vrot.slane %v1955_v42, %v3907_v19  ;;  %v1977_v12 = vrot.slane %v1952_v55, %v3907_v19 }
 0x3c6   : > { %v2006_v35 = vsel %vm1130_vm1, %v1981_v37, %v1977_v12 }
 0x3c7   : > { %v1958_v61 = vpop.permute.xlu1 %1957 }
 0x3c8   : > { %v1985_v32 = vrot.slane %v1958_v61, %v3907_v19 }
 0x3ca   : > { %v2007_v33 = vsel %vm1132_vm2, %v1985_v32, %v2006_v35 }
 0x3cb   : > { %v2098_v8 = vpop.permute.xlu1 %2097  ;;  %v2095_v23 = vpop.permute.xlu0 %2094 }
 0x3cc   : > { %v2124_v48 = vrot.slane %v2098_v8, %v3907_v19  ;;  %v2120_v58 = vrot.slane %v2095_v23, %v3907_v19 }
 0x3ce   : > { %v2149_v9 = vsel %vm1130_vm1, %v2124_v48, %v2120_v58 }
 0x3cf   : > { %v2101_v60 = vpop.permute.xlu1 %2100  ;;  %v1961_v14 = vpop.permute.xlu0 %1960 }
 0x3d0   : > { %v1989_v21 = vrot.slane %v1961_v14, %v3907_v19  ;;  %v2128_v0 = vrot.slane %v2101_v60, %v3907_v19 }
 0x3d2   : > { %v2008_v25 = vsel %vm1134_vm3, %v1989_v21, %v2007_v33  ;;  %v2150_v26 = vsel %vm1132_vm2, %v2128_v0, %v2149_v9 }
 0x3d3   : > { %v2104_v51 = vpop.permute.xlu1 %2103  ;;  %v1964_v59 = vpop.permute.xlu0 %1963 }
 0x3d4   : > { %v1993_v45 = vrot.slane %v1964_v59, %v3907_v19  ;;  %v2132_v57 = vrot.slane %v2104_v51, %v3907_v19 }
 0x3d6   : > { %v2009_v6 = vsel %vm1136_vm4, %v1993_v45, %v2008_v25  ;;  %v2151_v4 = vsel %vm1134_vm3, %v2132_v57, %v2150_v26  ;;  %v4859_v26 = vld [vmem:[#allocation40_spill] sm:$0xff] }
 0x3d7   : > { %v2107_v28 = vpop.permute.xlu1 %2106  ;;  %v1967_v5 = vpop.permute.xlu0 %1966 }
 0x3d8   : > { %v1997_v53 = vrot.slane %v1967_v5, %v3907_v19  ;;  %v2136_v49 = vrot.slane %v2107_v28, %v3907_v19 }
 0x3da   : > { %v2010_v11 = vsel %vm1138_vm5, %v1997_v53, %v2009_v6  ;;  %v2152_v62 = vsel %vm1136_vm4, %v2136_v49, %v2151_v4  ;;  %v4860_v4 = vld [vmem:[#allocation33_spill] sm:$0xff] }
 0x3db   : > { %v4508_v39 = vpop.permute.xlu1 %2240  ;;  %v2238_v7 = vpop.permute.xlu0 %2237 }
 0x3dc   : > { %v2267_v22 = vrot.slane %v4508_v39, %v3907_v19  ;;  %v2263_v18 = vrot.slane %v2238_v7, %v3907_v19 }
 0x3de   : > { %v2292_v23 = vsel %vm1130_vm1, %v2267_v22, %v2263_v18  ;;  %v4864_v18 = vld [vmem:[#allocation25_spill] sm:$0xff] }
 0x3df   : > { %v2110_v38 = vpop.permute.xlu1 %2109  ;;  %v1970_v29 = vpop.permute.xlu0 %1969 }
 0x3e0   : > { %v2001_v44 = vrot.slane %v1970_v29, %v3907_v19  ;;  %v2140_v41 = vrot.slane %v2110_v38, %v3907_v19 }
 0x3e2   : > { %v2011_v24 = vsel %vm1140_vm6, %v2001_v44, %v2010_v11  ;;  %v2153_v34 = vsel %vm1138_vm5, %v2140_v41, %v2152_v62 }
 0x3e3   : > { %v4515_v27 = vpop.permute.xlu1 %2380  ;;  %v2244_v47 = vpop.permute.xlu0 %2243 }
 0x3e4   : > { %v2271_v52 = vrot.slane %v2244_v47, %v3907_v19  ;;  %v2406_v28 = vrot.slane %v4515_v27, %v3907_v19 }
 0x3e6   : > { %v2293_v14 = vsel %vm1132_vm2, %v2271_v52, %v2292_v23 }
 0x3e7   : > { %v1973_v2 = vpop.permute.xlu1 %1972  ;;  %v2384_v16 = vpop.permute.xlu0 %2383 }
 0x3e8   : > { %v2005_v17 = vrot.slane %v1973_v2, %v3907_v19  ;;  %v2410_v60 = vrot.slane %v2384_v16, %v3907_v19 }
 0x3ea   : > { %v2012_v56 = vsel %vm1142_vm7, %v2005_v17, %v2011_v24  ;;  %v2435_v12 = vsel %vm1130_vm1, %v2410_v60, %v2406_v28 }
 0x3eb   : > { %v2247_v36 = vpop.permute.xlu1 %2246  ;;  %2910 = vmatmul.mubr.msk.f32.vlgmr.msra.gmra.mxu0 %vm1169_vm8, %v2012_v56  ;;  %v2113_v43 = vpop.permute.xlu0 %2112 }
 0x3ec   : > { %2918 = vmatpush3.msra.mxu0 %v381_v46  ;;  %2919 = vmatprep.mubr.msk.f32.mxu0 %vm3305_vm9, %v3304_v50  ;;  %v2144_v54 = vrot.slane %v2113_v43, %v3907_v19  ;;  %v2275_v42 = vrot.slane %v2247_v36, %v3907_v19 }
 0x3ee   : > { %v2154_v63 = vsel %vm1140_vm6, %v2144_v54, %v2153_v34  ;;  %v2294_v5 = vsel %vm1134_vm3, %v2275_v42, %v2293_v14  ;;  %v4862_v34 = vld [vmem:[#allocation22_spill] sm:$0xff] }
 0x3ef   : > { %v2116_v3 = vpop.permute.xlu1 %2115  ;;  %v2387_v30 = vpop.permute.xlu0 %2386 }
 0x3f0   : > { %v2148_v13 = vrot.slane %v2116_v3, %v3907_v19  ;;  %v2414_v51 = vrot.slane %v2387_v30, %v3907_v19  ;;  %v4861_v3 = vld [vmem:[#allocation24_spill] sm:$0xff] }
 0x3f2   : > { %v2155_v15 = vsel %vm1142_vm7, %v2148_v13, %v2154_v63  ;;  %v2436_v27 = vsel %vm1132_vm2, %v2414_v51, %v2435_v12  ;;  %v4866_v51 = vld [vmem:[#allocation28_spill] sm:$0xff] }
 0x3f3   : > { %v2390_v40 = vpop.permute.xlu1 %2389  ;;  %2915 = vmatmul.mubr.msk.f32.vlgmr.msra.gmra.mxu1 %vm1169_vm8, %v2155_v15  ;;  %v2250_v1 = vpop.permute.xlu0 %2249 }
 0x3f4   : > { %2923 = vmatpush3.msra.mxu1 %v382_v20  ;;  %2924 = vmatprep.mubr.msk.f32.mxu1 %vm3305_vm9, %v3304_v50  ;;  %v2279_v55 = vrot.slane %v2250_v1, %v3907_v19  ;;  %v2418_v39 = vrot.slane %v2390_v40, %v3907_v19 }
 0x3f6   : > { %v2295_v7 = vsel %vm1136_vm4, %v2279_v55, %v2294_v5  ;;  %v2437_v53 = vsel %vm1134_vm3, %v2418_v39, %v2436_v27 }
 0x3f7   : > { %v2393_v10 = vpop.permute.xlu1 %2392  ;;  %v2253_v31 = vpop.permute.xlu0 %2252 }
 0x3f8   : > { %v2283_v50 = vrot.slane %v2253_v31, %v3907_v19  ;;  %v2422_v38 = vrot.slane %v2393_v10, %v3907_v19  ;;  %v4863_v31 = vld [vmem:[#allocation29_spill] sm:$0xff] }
 0x3fa   : > { %v2296_v32 = vsel %vm1138_vm5, %v2283_v50, %v2295_v7  ;;  %v2438_v44 = vsel %vm1136_vm4, %v2422_v38, %v2437_v53  ;;  %v4865_v50 = vld [vmem:[#allocation31_spill] sm:$0xff] }
 0x3fb   : > { %v2396_v61 = vpop.permute.xlu1 %2395  ;;  %v2256_v8 = vpop.permute.xlu0 %2255 }
 0x3fc   : > { %v2287_v59 = vrot.slane %v2256_v8, %v3907_v19  ;;  %v2426_v21 = vrot.slane %v2396_v61, %v3907_v19 }
 0x3fe   : > { %v2297_v47 = vsel %vm1140_vm6, %v2287_v59, %v2296_v32  ;;  %v2439_v6 = vsel %vm1138_vm5, %v2426_v21, %v2438_v44 }
 0x3ff   : > { %v2399_v29 = vpop.permute.xlu1 %2398  ;;  %v2259_v37 = vpop.permute.xlu0 %2258 }
 0x400   : > { %v2291_v45 = vrot.slane %v2259_v37, %v3907_v19  ;;  %v2430_v35 = vrot.slane %v2399_v29, %v3907_v19 }
 0x402   : > { %v2298_v33 = vsel %vm1142_vm7, %v2291_v45, %v2297_v47  ;;  %v2440_v16 = vsel %vm1140_vm6, %v2430_v35, %v2439_v6 }
 0x403   : > { %2920 = vmatmul.mubr.msk.f32.vlgmr.msra.gmra.mxu0 %vm1169_vm8, %v2298_v33  ;;  %v2402_v25 = vpop.permute.xlu0 %2401  ;;  %v2546_v58 = vpop.permute.xlu1 %2545 }
 0x404   : > { %v2434_v2 = vrot.slane %v2402_v25, %v3907_v19  ;;  %v2583_v30 = vsel %vm839_vm0, %v4861_v3, %v2546_v58  ;;  %v4867_v25 = vld [vmem:[#allocation52_spill] sm:$0xff] }
 0x406   : > { %v2441_v48 = vsel %vm1142_vm7, %v2434_v2, %v2440_v16  ;;  %v4868_v2 = vld [vmem:[#allocation51_spill] sm:$0xff] }
 0x407   : > { %2925 = vmatmul.mubr.msk.f32.vlgmr.msra.gmra.mxu1 %vm1169_vm8, %v2441_v48  ;;  %v2534_v11 = vpop.permute.xlu0 %2533  ;;  %v2570_v17 = vpop.permute.xlu1 %2569 }
 0x408   : > { %v2580_v13 = vsel %vm839_vm0, %v4862_v34, %v2534_v11  ;;  %v2589_v22 = vsel %vm839_vm0, %v4863_v31, %v2570_v17 }
 0x40b   : > { %v2558_v0 = vpop.permute.xlu0 %2557  ;;  %v2606_v24 = vpop.permute.xlu1 %2605 }
 0x40c   : > { %v2586_v52 = vsel %vm839_vm0, %v4864_v18, %v2558_v0  ;;  %v2643_v14 = vsel %vm839_vm0, %v4865_v50, %v2606_v24 }
 0x40f   : > { %v2594_v46 = vpop.permute.xlu0 %2593  ;;  %v2630_v57 = vpop.permute.xlu1 %2629 }
 0x410   : > { %v2649_v54 = vsel %vm839_vm0, %v4859_v26, %v2630_v57  ;;  %v2640_v59 = vsel %vm839_vm0, %v4866_v51, %v2594_v46 }
 0x413   : > { %v2618_v56 = vpop.permute.xlu0 %2617  ;;  %v2538_v49 = vpop.permute.xlu1 %2537 }
 0x414   : > { %v2646_v62 = vsel %vm839_vm0, %v4860_v4, %v2618_v56  ;;  %v2581_v1 = vsel %vm2527_vm10, %v2580_v13, %v2538_v49 }
 0x417   : > { %v2550_v36 = vpop.permute.xlu0 %2549  ;;  %v2562_v43 = vpop.permute.xlu1 %2561 }
 0x418   : > { %v2584_v10 = vsel %vm2527_vm10, %v2583_v30, %v2550_v36  ;;  %v2587_v23 = vsel %vm2527_vm10, %v2586_v52, %v2562_v43 }
 0x41b   : > { %v2574_v9 = vpop.permute.xlu0 %2573  ;;  %v2598_v19 = vpop.permute.xlu1 %2597 }
 0x41c   : > { %v2590_v60 = vsel %vm2527_vm10, %v2589_v22, %v2574_v9  ;;  %v2641_v38 = vsel %vm2527_vm10, %v2640_v59, %v2598_v19 }
 0x41f   : > { %v2610_v41 = vpop.permute.xlu0 %2609  ;;  %v2622_v63 = vpop.permute.xlu1 %2621 }
 0x420   : > { %v2647_v15 = vsel %vm2527_vm10, %v2646_v62, %v2622_v63  ;;  %v2644_v29 = vsel %vm2527_vm10, %v2643_v14, %v2610_v41 }
 0x423   : > { %v2634_v20 = vpop.permute.xlu0 %2633  ;;  %v2554_v42 = vpop.permute.xlu1 %2553 }
 0x424   : > { %v4595_v40 = vsel %vm2527_vm10, %v2649_v54, %v2634_v20  ;;  %v2585_v61 = vsel %vm2529_vm11, %v2584_v10, %v2554_v42 }
 0x425   : > { %2653 = vst [vmem:[%s4607_s13 + $0x8] sm:$0xff] %v2585_v61 }
 0x427   : > { %v2542_v55 = vpop.permute.xlu0 %2541  ;;  %v2578_v28 = vpop.permute.xlu1 %2577 }
 0x428   : > { %v2582_v8 = vsel %vm2529_vm11, %v2581_v1, %v2542_v55  ;;  %v2591_v39 = vsel %vm2529_vm11, %v2590_v60, %v2578_v28 }
 0x429   : > { %2652 = vst [vmem:[%s4607_s13] sm:$0xff] %v2582_v8  ;;  %2655 = vst [vmem:[%s4607_s13 + $0x18] sm:$0xff] %v2591_v39 }
 0x42b   : > { %v2566_v5 = vpop.permute.xlu0 %2565  ;;  %v2614_v37 = vpop.permute.xlu1 %2613 }
 0x42c   : > { %v2588_v7 = vsel %vm2529_vm11, %v2587_v23, %v2566_v5  ;;  %v2645_v32 = vsel %vm2529_vm11, %v2644_v29, %v2614_v37 }
 0x42d   : > { %2654 = vst [vmem:[%s4607_s13 + $0x10] sm:$0xff] %v2588_v7  ;;  %2657 = vst [vmem:[%s4607_s13 + $0x28] sm:$0xff] %v2645_v32 }
 0x42f   : > { %v2602_v12 = vpop.permute.xlu0 %2601 }
 0x430   : > { %v2642_v21 = vsel %vm2529_vm11, %v2641_v38, %v2602_v12 }
 0x431   : > { %2656 = vst [vmem:[%s4607_s13 + $0x20] sm:$0xff] %v2642_v21 }
 0x4ab   : > { %v2081_v45 = vpop.f32.mrf.mxu0 }
 0x4ad   : > { %v2911_v27 = vpop.f32.mrf.mxu0 }
 0x4b3   : > { %v2224_v47 = vpop.f32.mrf.mxu1 }
 0x4b4   : > { %2515 = vrot.lane.b32.xlu1 %v2224_v47, %s3306_s28 }
 0x4b5   : > { %v2916_v35 = vpop.f32.mrf.mxu1 }
 0x4c3   : > { %v2367_v53 = vpop.f32.mrf.mxu0 }
 0x4c4   : > { %2519 = vrot.lane.b32.xlu0 %v2367_v53, %s3307_s16 }
 0x4c5   : > { %v2921_v33 = vpop.f32.mrf.mxu0 }
 0x4c7   : > { %v2510_v44 = vpop.f32.mrf.mxu1 }
 0x4c8   : > { %2625 = vrot.lane.b32.xlu0 %v4867_v25, %s3308_s12  ;;  %2523 = vrot.lane.b32.xlu1 %v2510_v44, %s3308_s12 }
 0x4c9   : > { %v2926_v6 = vpop.f32.mrf.mxu1 }
 0x4cc   : > { %2637 = vrot.lane.b32.xlu1 %v4868_v2, %s3308_s12 }
 0x526   : > { %v2516_v16 = vpop.permute.xlu1 %2515 }
 0x527   : > { %v2526_v58 = vsel %vm839_vm0, %v2081_v45, %v2516_v16 }
 0x536   : > { %v2520_v48 = vpop.permute.xlu0 %2519 }
 0x537   : > { %v2528_v11 = vsel %vm2527_vm10, %v2526_v58, %v2520_v48 }
 0x53a   : > { %v2524_v17 = vpop.permute.xlu1 %2523  ;;  %v2626_v0 = vpop.permute.xlu0 %2625 }
 0x53b   : > { %v2530_v24 = vsel %vm2529_vm11, %v2528_v11, %v2524_v17  ;;  %v2648_v46 = vsel %vm2529_vm11, %v2647_v15, %v2626_v0 }
 0x53c   : > { %2531 = vst [vmem:[%s363_s0] sm:$0xff] %v2530_v24  ;;  %2658 = vst [vmem:[%s4607_s13 + $0x30] sm:$0xff] %v2648_v46 }
 0x53d   : > { %3205 = shalt.err (!%p3202_p0)
}
 0x53e   : > { %s3206_s7 = scalar_lea.hbm %s4639_s14, 128  ;;  %s3210_s12 = scalar_lea.hbm %s4720_s4, 256 }
 0x53f   : > { %p3207_p11 = scmp.ne.s32.totalorder %s4639_s14, %s3206_s7  ;;  %p3211_p7 = scmp.lt.s32.totalorder %s4639_s14, %s4720_s4 }
 0x540   : > { %p3212_p2 = scmp.lt.s32.totalorder %s3210_s12, %s3206_s7 }
 0x541   : > { %p3208_p4 = pnand %p3207_p11, %p4869_p10 }
 0x542   : > { %p3213_p8 = por %p3212_p2, %p3211_p7 }
 0x543   : > { %p3209_p5 = pneg %p3208_p4 }
 0x545   : > { %p3214_p13 = pnand %p3213_p8, %p3209_p5 }
 0x547   : > { %3217 = shalt.err (!%p3214_p13)
}
 0x548   : > { %2935 = dma.vmem_to_hbm [thread:$0]  (%p4869_p10), %s4641_s24, 128, %s4639_s14, %s2661_s10   ;;  %v2638_v57 = vpop.permute.xlu1 %2637 }
 0x549   : > { %s4674_s25 = scalar_lea.hbm %s4721_s5, %s2898_s8  ;;  %v2651_v56 = vsel %vm2529_vm11, %v4595_v40, %v2638_v57  ;;  %s2666_s27 = scalar_lea.sflag [#allocation12], %s3554_s23 }
 0x54a   : > { %2659 = vst [vmem:[%s4607_s13 + $0x38] sm:$0xff] %v2651_v56  ;;  %s3218_s17 = scalar_lea.vmem %s2694_s9, 1024  ;;  %s3310_s24 = smov [#allocation11]  }
 0x54b   : > { %p3219_p1 = scmp.ne.s32.totalorder %s2694_s9, %s3218_s17  ;;  %s3222_s14 = sshll.u32 %s3310_s24, 4  ;;  %s3223_s14 = int_to_ptr.vmem [resolvable:$false] %s3222_s14 }
 0x54c   : > { %s3224_s22 = scalar_lea.vmem %s3223_s14, 2048  ;;  %p3225_p6 = scmp.lt.s32.totalorder %s2694_s9, %s3223_s14 }
 0x54d   : > { %p3220_p3 = pnand %p3219_p1, %p4869_p10  ;;  %p3226_p12 = scmp.lt.s32.totalorder %s3224_s22, %s3218_s17 }
 0x54f   : > { %p3221_p9 = pneg %p3220_p3  ;;  %p3227_p0 = por %p3226_p12, %p3225_p6 }
 0x551   : > { %p3228_p11 = pnand %p3227_p0, %p3221_p9 }
 0x553   : > { %3231 = shalt.err (!%p3228_p11)
}
 0x554   : > { %s3232_s13 = scalar_lea.hbm %s4674_s25, 1024  ;;  %s3236_s10 = scalar_lea.hbm %s4721_s5, 2048 }
 0x555   : > { %p3233_p4 = scmp.ne.s32.totalorder %s4674_s25, %s3232_s13  ;;  %p3237_p2 = scmp.lt.s32.totalorder %s4674_s25, %s4721_s5 }
 0x556   : > { %p3238_p8 = scmp.lt.s32.totalorder %s3236_s10, %s3232_s13 }
 0x557   : > { %p3234_p5 = pnand %p3233_p4, %p4869_p10 }
 0x558   : > { %p3239_p13 = por %p3238_p8, %p3237_p2 }
 0x559   : > { %p3235_p7 = pneg %p3234_p5 }
 0x55b   : > { %p3240_p1 = pnand %p3239_p13, %p3235_p7 }
 0x55d   : > { %3243 = shalt.err (!%p3240_p1)
}
 0x55e   : > { %2936 = dma.vmem_to_hbm [thread:$0]  (%p4869_p10), %s2694_s9, 1024, %s4674_s25, %s2666_s27  }
 0x55f PF: > { %s2705_s26 = sand.u32 1, %s3282_s18   ;;  %p4870_p3 = scmp.ne.s32.totalorder %s4778_s30, 0 }
 0x560   : > { %p4871_p9 = scmp.ge.s32.totalorder %s3294_s21, 2  ;;  %s2706_s7 = scalar_lea.sflag [#allocation4], %s2705_s26 }
 0x562   : > { %p2953_p6 = pnand %p4871_p9, %p4870_p3 }
 0x564   : > { %p2954_p12 = pneg %p2953_p6 }
 0x566   : > { %3273 = dma.done.wait (%p2954_p12), %s2706_s7, 128  }
 0x567   : > { %3275 = vsyncadd (%p2954_p12), %s2706_s7, 4294967168  ;;  %s2715_s28 = scalar_lea.sflag [#allocation12], %s2705_s26 }
 0x568   : > { %3277 = dma.done.wait (%p2954_p12), %s2715_s28, 1024  }
 0x569   : > { %3279 = vsyncadd (%p2954_p12), %s2715_s28, 4294966272  ;;  %s4872_s21 = sld [smem:[#allocation19_spill]]  ;;  %s4875_s18 = smov %s3286_s19 }
 0x56a   : > { %s4873_s29 = sld [smem:[#allocation18_spill]] }
 0x56b   : > { %s4874_s20 = sld [smem:[#allocation20_spill]] }
 0x56f   : > { %p28_p10 = scmp.ge.s32.totalorder %s4872_s21, 4  }
 0x570   : > { %s4876_s19 = smov %s4873_s29 }
 0x571   :  { %30 = sbr.rel (!%p28_p10) target bundleno = 14 (0xe), region = 135 }
 0x576   :  { %2720 = vsyncpa [#allocation3], 1 }
 0x577   :  { %2722 = vsyncpa [#allocation3 + $0x1], 1 }
 0x578   :  { %2723 = vsyncpa [#allocation6], 1 }
 0x579   :  { %2725 = vsyncpa [#allocation6 + $0x1], 1 }
 0x57a   :  { %2726 = vsyncpa [#allocation9], 1 }
 0x57b   :  { %2728 = vsyncpa [#allocation9 + $0x1], 1 }
 0x57c   :  { %2729 = vsyncpa [#allocation4], 1 }
 0x57d   :  { %2731 = vsyncpa [#allocation4 + $0x1], 1 }
 0x57e   :  { %2732 = vsyncpa [#allocation12], 1 }
 0x57f   :  { %2734 = vsyncpa [#allocation12 + $0x1], 1 }

</bundles_post_ra>
